<compile_context>
chip_gen: v7x
topology: tpu7x:2x2x1
jax: 0.10.0
libtpu: 0.0.40
codegen_flags: <defaults>
</compile_context>

<pallas_src>
import numpy as np
import jax
import jax.numpy as jnp
from jax.experimental import pallas as pl
from jax.experimental.pallas import tpu as pltpu


def basic_block_kernel(xcol_ref, w1_ref, s1_ref, b1_ref,
                       w2_ref, s2_ref, b2_ref, idn_ref,
                       out_ref, midcol_ref):
    """One image per grid step.

    xcol_ref      : (1, H+2, W, 3*Cin) bf16  dx-im2col of zero-padded input
    w1_ref        : (3, 3*Cin, Cout)   bf16  conv1 taps, one (3*Cin,Cout) per dy
    s1_ref, b1_ref: (1, Cout)          f32   folded BN1 scale / bias
    w2_ref        : (3, 3*Cout, Cout)  bf16
    s2_ref, b2_ref: (1, Cout)          f32
    idn_ref       : (1, H, W, Cout)    f32   residual identity (== x)
    out_ref       : (1, H, W, Cout)    f32
    midcol_ref    : (H+2, W, 3*Cout)   f32   scratch: dx-im2col of relu(bn1(conv1))
    """
    _, HP, W, K1 = xcol_ref.shape
    H = HP - 2
    C = out_ref.shape[-1]
    K2 = 3 * C
    mxu_dtype = w1_ref.dtype

    # ---- conv1 (3 dots, K = 3*Cin) + BN1 + ReLU ----------------------------
    acc = jnp.zeros((H * W, C), jnp.float32)
    for dy in range(3):                               # short, unrolled tap loop
        patch = xcol_ref[0, dy:dy + H, :, :].reshape(H * W, K1)
        acc = acc + jnp.dot(patch, w1_ref[dy],
                            preferred_element_type=jnp.float32)
    o1 = jnp.maximum(acc * s1_ref[...] + b1_ref[...], 0.0)       # f32 epilogue
    o1 = o1.reshape(H, W, C)

    # ---- build dx-im2col of the zero-padded o1 in scratch -------------------
    # midcol[y, x, dx*C + c] == pad(o1)[y, x + dx, c]
    # Zero only the halo (2 rows + 2 columns); the interior is fully
    # overwritten every grid step.
    zrow = jnp.zeros((1, W, K2), jnp.float32)
    midcol_ref[0:1, :, :] = zrow
    midcol_ref[HP - 1:HP, :, :] = zrow
    zcol = jnp.zeros((H, 1, C), jnp.float32)
    midcol_ref[1:1 + H, 0:1, 0:C] = zcol                       # dx=0, x=0
    midcol_ref[1:1 + H, 1:W, 0:C] = o1[:, 0:W - 1, :]
    midcol_ref[1:1 + H, :, C:2 * C] = o1                       # dx=1
    midcol_ref[1:1 + H, 0:W - 1, 2 * C:3 * C] = o1[:, 1:W, :]
    midcol_ref[1:1 + H, W - 1:W, 2 * C:3 * C] = zcol           # dx=2, x=W-1

    # ---- conv2 (3 dots, K = 3*Cout) + BN2 + residual + ReLU -----------------
    acc = jnp.zeros((H * W, C), jnp.float32)
    for dy in range(3):
        patch = midcol_ref[dy:dy + H, :, :].reshape(H * W, K2).astype(mxu_dtype)
        acc = acc + jnp.dot(patch, w2_ref[dy],
                            preferred_element_type=jnp.float32)
    o2 = acc * s2_ref[...] + b2_ref[...] + idn_ref[0].reshape(H * W, C)
    out_ref[0] = jnp.maximum(o2, 0.0).reshape(H, W, C)


def basic_block_forward(x_nchw, params, eps=1e-5, mxu_dtype=jnp.bfloat16):
    """NCHW in -> NCHW out (matches the PyTorch module, eval-mode BN)."""
    x = jnp.transpose(x_nchw, (0, 2, 3, 1)).astype(jnp.float32)   # NHWC, f32
    N, H, W, Cin = x.shape
    Cout = params["w1"].shape[0]
    assert Cin == Cout, "downsample=None requires in_channel == out_channel"
    # TODO(synk): stride>1 / downsample branch not implemented.

    # dx-im2col of the zero-padded input, built once by XLA:
    # xcol[n, y, x, dx*Cin + c] = xpad[n, y, x + dx, c]
    xpad = jnp.pad(x, ((0, 0), (1, 1), (1, 1), (0, 0))).astype(mxu_dtype)
    xcol = jnp.concatenate([xpad[:, :, dx:dx + W, :] for dx in range(3)],
                           axis=-1)                        # (N, H+2, W, 3*Cin)

    # PyTorch conv weight (Cout, Cin, 3, 3) -> (dy, dx*Cin, Cout)
    def conv_weight(w):
        co, ci = w.shape[0], w.shape[1]
        return jnp.transpose(w, (2, 3, 1, 0)).reshape(3, 3 * ci, co).astype(mxu_dtype)
    w1c, w2c = conv_weight(params["w1"]), conv_weight(params["w2"])

    # Fold eval-mode BatchNorm into per-channel (scale, bias), kept f32.
    def bn_fold(g, b, m, v):
        s = g / jnp.sqrt(v + eps)
        return (s.reshape(1, Cout).astype(jnp.float32),
                (b - m * s).reshape(1, Cout).astype(jnp.float32))
    s1, b1 = bn_fold(params["gamma1"], params["beta1"],
                     params["mean1"], params["var1"])
    s2, b2 = bn_fold(params["gamma2"], params["beta2"],
                     params["mean2"], params["var2"])

    const3 = lambda n: (0, 0, 0)
    const2 = lambda n: (0, 0)
    out_nhwc = pl.pallas_call(
        basic_block_kernel,
        out_shape=jax.ShapeDtypeStruct((N, H, W, Cout), jnp.float32),
        grid_spec=pltpu.PrefetchScalarGridSpec(
            num_scalar_prefetch=0,
            grid=(N,),
            in_specs=[
                pl.BlockSpec((1, H + 2, W, 3 * Cin), lambda n: (n, 0, 0, 0)),
                pl.BlockSpec((3, 3 * Cin, Cout), const3),
                pl.BlockSpec((1, Cout), const2),
                pl.BlockSpec((1, Cout), const2),
                pl.BlockSpec((3, 3 * Cout, Cout), const3),
                pl.BlockSpec((1, Cout), const2),
                pl.BlockSpec((1, Cout), const2),
                pl.BlockSpec((1, H, W, Cout), lambda n: (n, 0, 0, 0)),
            ],
            out_specs=pl.BlockSpec((1, H, W, Cout), lambda n: (n, 0, 0, 0)),
            scratch_shapes=[pltpu.VMEM((H + 2, W, 3 * Cout), jnp.float32)],
        ),
        compiler_params=pltpu.CompilerParams(
            dimension_semantics=("parallel",),      # v7x: shard batch on 2 TCs
            vmem_limit_bytes=32 * 1024 * 1024),     # >> per-step working set
    )(xcol, w1c, s1, b1, w2c, s2, b2, x)

    return jnp.transpose(out_nhwc, (0, 3, 1, 2))    # back to NCHW


def reference_forward(x, params, eps=1e-5, conv_dtype=jnp.bfloat16):
    """Pure-JAX reference (NCHW). Conv operands are rounded to the kernel's
    MXU input precision (bf16) so the comparison isolates kernel correctness
    from expected bf16 quantization; all other math is f32."""
    def qcast(a):
        return a.astype(conv_dtype).astype(jnp.float32)

    def conv(v, w):
        return jax.lax.conv_general_dilated(
            qcast(v), qcast(w), window_strides=(1, 1), padding=((1, 1), (1, 1)),
            dimension_numbers=("NCHW", "OIHW", "NCHW"))

    def bn(v, g, b, m, var):
        g, b, m, var = (t[None, :, None, None] for t in (g, b, m, var))
        return (v - m) / jnp.sqrt(var + eps) * g + b

    o = jax.nn.relu(bn(conv(x, params["w1"]), params["gamma1"],
                       params["beta1"], params["mean1"], params["var1"]))
    o = bn(conv(o, params["w2"]), params["gamma2"],
           params["beta2"], params["mean2"], params["var2"])
    return jax.nn.relu(o + x)


def make_params(key, cin, cout):
    k1, k2 = jax.random.split(key)
    c = cout
    return {
        "w1": 0.1 * jax.random.normal(k1, (cout, cin, 3, 3), jnp.float32),
        "w2": 0.1 * jax.random.normal(k2, (cout, cout, 3, 3), jnp.float32),
        "gamma1": jnp.linspace(0.5, 1.5, c, dtype=jnp.float32),
        "beta1": jnp.linspace(-0.1, 0.1, c, dtype=jnp.float32),
        "mean1": 0.05 * jnp.arange(c, dtype=jnp.float32),
        "var1": 1.0 + 0.1 * jnp.arange(c, dtype=jnp.float32),
        "gamma2": jnp.linspace(1.2, 0.8, c, dtype=jnp.float32),
        "beta2": jnp.linspace(0.05, -0.05, c, dtype=jnp.float32),
        "mean2": -0.03 * jnp.arange(c, dtype=jnp.float32),
        "var2": 1.0 + 0.05 * jnp.arange(c, dtype=jnp.float32),
    }


if __name__ == "__main__":
    key = jax.random.PRNGKey(0)
    kx, kp = jax.random.split(key)

    N, C, H, W = 2, 4, 16, 16          # in_channel = out_channel = 4, stride = 1
    x = jax.random.normal(kx, (N, C, H, W), jnp.float32)
    params = make_params(kp, C, C)

    out = jax.block_until_ready(basic_block_forward(x, params))
    ref = jax.block_until_ready(reference_forward(x, params))

    # Tolerance covers f32 accumulation-order differences plus rare 1-ulp
    # bf16 double-rounding of the intermediate activation.
    np.testing.assert_allclose(np.asarray(out), np.asarray(ref),
                               rtol=2e-3, atol=2e-3)
    print("KERNEL_OK")
</pallas_src>

<mosaic_0001>
module attributes {stable_mosaic.version = 11 : i64} {
  func.func @basic_block_kernel(%arg0: i32, %arg1: memref<1x18x16x12xbf16, #tpu.memory_space<vmem>>, %arg2: memref<3x12x4xbf16, #tpu.memory_space<vmem>>, %arg3: memref<1x4xf32, #tpu.memory_space<vmem>>, %arg4: memref<1x4xf32, #tpu.memory_space<vmem>>, %arg5: memref<3x12x4xbf16, #tpu.memory_space<vmem>>, %arg6: memref<1x4xf32, #tpu.memory_space<vmem>>, %arg7: memref<1x4xf32, #tpu.memory_space<vmem>>, %arg8: memref<1x16x16x4xf32, #tpu.memory_space<vmem>>, %arg9: memref<1x16x16x4xf32, #tpu.memory_space<vmem>>, %arg10: memref<18x16x12xf32, #tpu.memory_space<vmem>>) attributes {dimension_semantics = [#tpu.dimension_semantics<parallel>], iteration_bounds = array<i64: 2>, scalar_prefetch = 0 : i64, scratch_operands = 1 : i64, tpu.core_type = #tpu.core_type<tc>, window_params = [{transform_indices = @transform_0, window_bounds = array<i64: 1, 18, 16, 12>}, {pipeline_mode = #tpu.pipeline_mode<synchronous>, transform_indices = @transform_1, window_bounds = array<i64: 3, 12, 4>}, {pipeline_mode = #tpu.pipeline_mode<synchronous>, transform_indices = @transform_2, window_bounds = array<i64: 1, 4>}, {pipeline_mode = #tpu.pipeline_mode<synchronous>, transform_indices = @transform_3, window_bounds = array<i64: 1, 4>}, {pipeline_mode = #tpu.pipeline_mode<synchronous>, transform_indices = @transform_4, window_bounds = array<i64: 3, 12, 4>}, {pipeline_mode = #tpu.pipeline_mode<synchronous>, transform_indices = @transform_5, window_bounds = array<i64: 1, 4>}, {pipeline_mode = #tpu.pipeline_mode<synchronous>, transform_indices = @transform_6, window_bounds = array<i64: 1, 4>}, {transform_indices = @transform_7, window_bounds = array<i64: 1, 16, 16, 4>}, {transform_indices = @transform_8, window_bounds = array<i64: 1, 16, 16, 4>}]} {
    %cst = arith.constant 0.000000e+00 : f32
    %0 = vector.broadcast %cst : f32 to vector<256x4xf32>
    %c0 = arith.constant 0 : index
    %c0_0 = arith.constant 0 : index
    %c0_1 = arith.constant 0 : index
    %c0_2 = arith.constant 0 : index
    %1 = vector.load %arg1[%c0, %c0_0, %c0_1, %c0_2] : memref<1x18x16x12xbf16, #tpu.memory_space<vmem>>, vector<1x16x16x12xbf16>
    %2 = vector.shape_cast %1 : vector<1x16x16x12xbf16> to vector<16x16x12xbf16>
    %3 = vector.shape_cast %2 : vector<16x16x12xbf16> to vector<256x12xbf16>
    %c0_3 = arith.constant 0 : index
    %c0_4 = arith.constant 0 : index
    %c0_5 = arith.constant 0 : index
    %4 = vector.load %arg2[%c0_3, %c0_4, %c0_5] : memref<3x12x4xbf16, #tpu.memory_space<vmem>>, vector<1x12x4xbf16>
    %5 = vector.shape_cast %4 : vector<1x12x4xbf16> to vector<12x4xbf16>
    %cst_6 = arith.constant dense<0.000000e+00> : vector<256x4xf32>
    %6 = tpu.matmul %3, %5, %cst_6 {dimension_numbers = #tpu.dot_dimension_numbers<[1], [0], [0], [1], [0, 0, 1, 1], [], []>} : vector<256x12xbf16>, vector<12x4xbf16>, vector<256x4xf32> -> vector<256x4xf32>
    %7 = arith.addf %0, %6 : vector<256x4xf32>
    %c0_7 = arith.constant 0 : index
    %c1 = arith.constant 1 : index
    %c0_8 = arith.constant 0 : index
    %c0_9 = arith.constant 0 : index
    %8 = vector.load %arg1[%c0_7, %c1, %c0_8, %c0_9] : memref<1x18x16x12xbf16, #tpu.memory_space<vmem>>, vector<1x16x16x12xbf16>
    %9 = vector.shape_cast %8 : vector<1x16x16x12xbf16> to vector<16x16x12xbf16>
    %10 = vector.shape_cast %9 : vector<16x16x12xbf16> to vector<256x12xbf16>
    %c1_10 = arith.constant 1 : index
    %c0_11 = arith.constant 0 : index
    %c0_12 = arith.constant 0 : index
    %11 = vector.load %arg2[%c1_10, %c0_11, %c0_12] : memref<3x12x4xbf16, #tpu.memory_space<vmem>>, vector<1x12x4xbf16>
    %12 = vector.shape_cast %11 : vector<1x12x4xbf16> to vector<12x4xbf16>
    %cst_13 = arith.constant dense<0.000000e+00> : vector<256x4xf32>
    %13 = tpu.matmul %10, %12, %cst_13 {dimension_numbers = #tpu.dot_dimension_numbers<[1], [0], [0], [1], [0, 0, 1, 1], [], []>} : vector<256x12xbf16>, vector<12x4xbf16>, vector<256x4xf32> -> vector<256x4xf32>
    %14 = arith.addf %7, %13 : vector<256x4xf32>
    %c0_14 = arith.constant 0 : index
    %c2 = arith.constant 2 : index
    %c0_15 = arith.constant 0 : index
    %c0_16 = arith.constant 0 : index
    %15 = vector.load %arg1[%c0_14, %c2, %c0_15, %c0_16] : memref<1x18x16x12xbf16, #tpu.memory_space<vmem>>, vector<1x16x16x12xbf16>
    %16 = vector.shape_cast %15 : vector<1x16x16x12xbf16> to vector<16x16x12xbf16>
    %17 = vector.shape_cast %16 : vector<16x16x12xbf16> to vector<256x12xbf16>
    %c2_17 = arith.constant 2 : index
    %c0_18 = arith.constant 0 : index
    %c0_19 = arith.constant 0 : index
    %18 = vector.load %arg2[%c2_17, %c0_18, %c0_19] : memref<3x12x4xbf16, #tpu.memory_space<vmem>>, vector<1x12x4xbf16>
    %19 = vector.shape_cast %18 : vector<1x12x4xbf16> to vector<12x4xbf16>
    %cst_20 = arith.constant dense<0.000000e+00> : vector<256x4xf32>
    %20 = tpu.matmul %17, %19, %cst_20 {dimension_numbers = #tpu.dot_dimension_numbers<[1], [0], [0], [1], [0, 0, 1, 1], [], []>} : vector<256x12xbf16>, vector<12x4xbf16>, vector<256x4xf32> -> vector<256x4xf32>
    %21 = arith.addf %14, %20 : vector<256x4xf32>
    %c0_21 = arith.constant 0 : index
    %c0_22 = arith.constant 0 : index
    %22 = vector.load %arg3[%c0_21, %c0_22] : memref<1x4xf32, #tpu.memory_space<vmem>>, vector<1x4xf32>
    %23 = vector.broadcast %22 : vector<1x4xf32> to vector<256x4xf32>
    %24 = arith.mulf %21, %23 : vector<256x4xf32>
    %c0_23 = arith.constant 0 : index
    %c0_24 = arith.constant 0 : index
    %25 = vector.load %arg4[%c0_23, %c0_24] : memref<1x4xf32, #tpu.memory_space<vmem>>, vector<1x4xf32>
    %26 = vector.broadcast %25 : vector<1x4xf32> to vector<256x4xf32>
    %27 = arith.addf %24, %26 : vector<256x4xf32>
    %cst_25 = arith.constant 0.000000e+00 : f32
    %28 = vector.broadcast %cst_25 : f32 to vector<256x4xf32>
    %29 = arith.maximumf %27, %28 : vector<256x4xf32>
    %30 = vector.shape_cast %29 : vector<256x4xf32> to vector<16x16x4xf32>
    %cst_26 = arith.constant 0.000000e+00 : f32
    %31 = vector.broadcast %cst_26 : f32 to vector<1x16x12xf32>
    %c0_27 = arith.constant 0 : index
    %c0_28 = arith.constant 0 : index
    %c0_29 = arith.constant 0 : index
    %32 = vector.load %arg10[%c0_27, %c0_28, %c0_29] : memref<18x16x12xf32, #tpu.memory_space<vmem>>, vector<1x16x12xf32>
    tpu.vector_store %arg10[%c0_27, %c0_28, %c0_29], %31 {strides = array<i32>} : memref<18x16x12xf32, #tpu.memory_space<vmem>>, vector<1x16x12xf32>,
    %c17 = arith.constant 17 : index
    %c0_30 = arith.constant 0 : index
    %c0_31 = arith.constant 0 : index
    %33 = vector.load %arg10[%c17, %c0_30, %c0_31] : memref<18x16x12xf32, #tpu.memory_space<vmem>>, vector<1x16x12xf32>
    tpu.vector_store %arg10[%c17, %c0_30, %c0_31], %31 {strides = array<i32>} : memref<18x16x12xf32, #tpu.memory_space<vmem>>, vector<1x16x12xf32>,
    %cst_32 = arith.constant 0.000000e+00 : f32
    %34 = vector.broadcast %cst_32 : f32 to vector<16x1x4xf32>
    %c1_33 = arith.constant 1 : index
    %c0_34 = arith.constant 0 : index
    %c0_35 = arith.constant 0 : index
    %35 = vector.load %arg10[%c1_33, %c0_34, %c0_35] : memref<18x16x12xf32, #tpu.memory_space<vmem>>, vector<16x1x4xf32>
    tpu.vector_store %arg10[%c1_33, %c0_34, %c0_35], %34 {strides = array<i32>} : memref<18x16x12xf32, #tpu.memory_space<vmem>>, vector<16x1x4xf32>,
    %36 = vector.extract_strided_slice %30 {offsets = [0, 0, 0], sizes = [16, 15, 4], strides = [1, 1, 1]} : vector<16x16x4xf32> to vector<16x15x4xf32>
    %c1_36 = arith.constant 1 : index
    %c1_37 = arith.constant 1 : index
    %c0_38 = arith.constant 0 : index
    %37 = vector.load %arg10[%c1_36, %c1_37, %c0_38] : memref<18x16x12xf32, #tpu.memory_space<vmem>>, vector<16x15x4xf32>
    tpu.vector_store %arg10[%c1_36, %c1_37, %c0_38], %36 {strides = array<i32>} : memref<18x16x12xf32, #tpu.memory_space<vmem>>, vector<16x15x4xf32>,
    %c1_39 = arith.constant 1 : index
    %c0_40 = arith.constant 0 : index
    %c4 = arith.constant 4 : index
    %38 = vector.load %arg10[%c1_39, %c0_40, %c4] : memref<18x16x12xf32, #tpu.memory_space<vmem>>, vector<16x16x4xf32>
    tpu.vector_store %arg10[%c1_39, %c0_40, %c4], %30 {strides = array<i32>} : memref<18x16x12xf32, #tpu.memory_space<vmem>>, vector<16x16x4xf32>,
    %39 = vector.extract_strided_slice %30 {offsets = [0, 1, 0], sizes = [16, 15, 4], strides = [1, 1, 1]} : vector<16x16x4xf32> to vector<16x15x4xf32>
    %c1_41 = arith.constant 1 : index
    %c0_42 = arith.constant 0 : index
    %c8 = arith.constant 8 : index
    %40 = vector.load %arg10[%c1_41, %c0_42, %c8] : memref<18x16x12xf32, #tpu.memory_space<vmem>>, vector<16x15x4xf32>
    tpu.vector_store %arg10[%c1_41, %c0_42, %c8], %39 {strides = array<i32>} : memref<18x16x12xf32, #tpu.memory_space<vmem>>, vector<16x15x4xf32>,
    %c1_43 = arith.constant 1 : index
    %c15 = arith.constant 15 : index
    %c8_44 = arith.constant 8 : index
    %41 = vector.load %arg10[%c1_43, %c15, %c8_44] : memref<18x16x12xf32, #tpu.memory_space<vmem>>, vector<16x1x4xf32>
    tpu.vector_store %arg10[%c1_43, %c15, %c8_44], %34 {strides = array<i32>} : memref<18x16x12xf32, #tpu.memory_space<vmem>>, vector<16x1x4xf32>,
    %cst_45 = arith.constant 0.000000e+00 : f32
    %42 = vector.broadcast %cst_45 : f32 to vector<256x4xf32>
    %c0_46 = arith.constant 0 : index
    %c0_47 = arith.constant 0 : index
    %c0_48 = arith.constant 0 : index
    %43 = vector.load %arg10[%c0_46, %c0_47, %c0_48] : memref<18x16x12xf32, #tpu.memory_space<vmem>>, vector<16x16x12xf32>
    %44 = vector.shape_cast %43 : vector<16x16x12xf32> to vector<256x12xf32>
    %45 = arith.truncf %44 : vector<256x12xf32> to vector<256x12xbf16>
    %c0_49 = arith.constant 0 : index
    %c0_50 = arith.constant 0 : index
    %c0_51 = arith.constant 0 : index
    %46 = vector.load %arg5[%c0_49, %c0_50, %c0_51] : memref<3x12x4xbf16, #tpu.memory_space<vmem>>, vector<1x12x4xbf16>
    %47 = vector.shape_cast %46 : vector<1x12x4xbf16> to vector<12x4xbf16>
    %cst_52 = arith.constant dense<0.000000e+00> : vector<256x4xf32>
    %48 = tpu.matmul %45, %47, %cst_52 {dimension_numbers = #tpu.dot_dimension_numbers<[1], [0], [0], [1], [0, 0, 1, 1], [], []>} : vector<256x12xbf16>, vector<12x4xbf16>, vector<256x4xf32> -> vector<256x4xf32>
    %49 = arith.addf %42, %48 : vector<256x4xf32>
    %c1_53 = arith.constant 1 : index
    %c0_54 = arith.constant 0 : index
    %c0_55 = arith.constant 0 : index
    %50 = vector.load %arg10[%c1_53, %c0_54, %c0_55] : memref<18x16x12xf32, #tpu.memory_space<vmem>>, vector<16x16x12xf32>
    %51 = vector.shape_cast %50 : vector<16x16x12xf32> to vector<256x12xf32>
    %52 = arith.truncf %51 : vector<256x12xf32> to vector<256x12xbf16>
    %c1_56 = arith.constant 1 : index
    %c0_57 = arith.constant 0 : index
    %c0_58 = arith.constant 0 : index
    %53 = vector.load %arg5[%c1_56, %c0_57, %c0_58] : memref<3x12x4xbf16, #tpu.memory_space<vmem>>, vector<1x12x4xbf16>
    %54 = vector.shape_cast %53 : vector<1x12x4xbf16> to vector<12x4xbf16>
    %cst_59 = arith.constant dense<0.000000e+00> : vector<256x4xf32>
    %55 = tpu.matmul %52, %54, %cst_59 {dimension_numbers = #tpu.dot_dimension_numbers<[1], [0], [0], [1], [0, 0, 1, 1], [], []>} : vector<256x12xbf16>, vector<12x4xbf16>, vector<256x4xf32> -> vector<256x4xf32>
    %56 = arith.addf %49, %55 : vector<256x4xf32>
    %c2_60 = arith.constant 2 : index
    %c0_61 = arith.constant 0 : index
    %c0_62 = arith.constant 0 : index
    %57 = vector.load %arg10[%c2_60, %c0_61, %c0_62] : memref<18x16x12xf32, #tpu.memory_space<vmem>>, vector<16x16x12xf32>
    %58 = vector.shape_cast %57 : vector<16x16x12xf32> to vector<256x12xf32>
    %59 = arith.truncf %58 : vector<256x12xf32> to vector<256x12xbf16>
    %c2_63 = arith.constant 2 : index
    %c0_64 = arith.constant 0 : index
    %c0_65 = arith.constant 0 : index
    %60 = vector.load %arg5[%c2_63, %c0_64, %c0_65] : memref<3x12x4xbf16, #tpu.memory_space<vmem>>, vector<1x12x4xbf16>
    %61 = vector.shape_cast %60 : vector<1x12x4xbf16> to vector<12x4xbf16>
    %cst_66 = arith.constant dense<0.000000e+00> : vector<256x4xf32>
    %62 = tpu.matmul %59, %61, %cst_66 {dimension_numbers = #tpu.dot_dimension_numbers<[1], [0], [0], [1], [0, 0, 1, 1], [], []>} : vector<256x12xbf16>, vector<12x4xbf16>, vector<256x4xf32> -> vector<256x4xf32>
    %63 = arith.addf %56, %62 : vector<256x4xf32>
    %c0_67 = arith.constant 0 : index
    %c0_68 = arith.constant 0 : index
    %64 = vector.load %arg6[%c0_67, %c0_68] : memref<1x4xf32, #tpu.memory_space<vmem>>, vector<1x4xf32>
    %65 = vector.broadcast %64 : vector<1x4xf32> to vector<256x4xf32>
    %66 = arith.mulf %63, %65 : vector<256x4xf32>
    %c0_69 = arith.constant 0 : index
    %c0_70 = arith.constant 0 : index
    %67 = vector.load %arg7[%c0_69, %c0_70] : memref<1x4xf32, #tpu.memory_space<vmem>>, vector<1x4xf32>
    %68 = vector.broadcast %67 : vector<1x4xf32> to vector<256x4xf32>
    %69 = arith.addf %66, %68 : vector<256x4xf32>
    %c0_71 = arith.constant 0 : index
    %c0_72 = arith.constant 0 : index
    %c0_73 = arith.constant 0 : index
    %c0_74 = arith.constant 0 : index
    %70 = vector.load %arg8[%c0_71, %c0_72, %c0_73, %c0_74] : memref<1x16x16x4xf32, #tpu.memory_space<vmem>>, vector<1x16x16x4xf32>
    %71 = vector.shape_cast %70 : vector<1x16x16x4xf32> to vector<16x16x4xf32>
    %72 = vector.shape_cast %71 : vector<16x16x4xf32> to vector<256x4xf32>
    %73 = arith.addf %69, %72 : vector<256x4xf32>
    %cst_75 = arith.constant 0.000000e+00 : f32
    %74 = vector.broadcast %cst_75 : f32 to vector<256x4xf32>
    %75 = arith.maximumf %73, %74 : vector<256x4xf32>
    %76 = vector.shape_cast %75 : vector<256x4xf32> to vector<16x16x4xf32>
    %c0_76 = arith.constant 0 : index
    %c0_77 = arith.constant 0 : index
    %c0_78 = arith.constant 0 : index
    %c0_79 = arith.constant 0 : index
    %77 = vector.load %arg9[%c0_76, %c0_77, %c0_78, %c0_79] : memref<1x16x16x4xf32, #tpu.memory_space<vmem>>, vector<1x16x16x4xf32>
    %78 = vector.shape_cast %77 : vector<1x16x16x4xf32> to vector<16x16x4xf32>
    %79 = vector.shape_cast %76 : vector<16x16x4xf32> to vector<1x16x16x4xf32>
    tpu.vector_store %arg9[%c0_76, %c0_77, %c0_78, %c0_79], %79 {strides = array<i32>} : memref<1x16x16x4xf32, #tpu.memory_space<vmem>>, vector<1x16x16x4xf32>,
    return
  }
  func.func @transform_0(%arg0: i32) -> (i32, i32, i32, i32) {
    %c0_i32 = arith.constant 0 : i32
    %c0_i32_0 = arith.constant 0 : i32
    %c0_i32_1 = arith.constant 0 : i32
    %c0_i32_2 = arith.constant 0 : i32
    return %arg0, %c0_i32, %c0_i32_0, %c0_i32_1 : i32, i32, i32, i32
  }
  func.func @transform_1(%arg0: i32) -> (i32, i32, i32) {
    %c0_i32 = arith.constant 0 : i32
    %c0_i32_0 = arith.constant 0 : i32
    %c0_i32_1 = arith.constant 0 : i32
    %c0_i32_2 = arith.constant 0 : i32
    return %c0_i32, %c0_i32_0, %c0_i32_1 : i32, i32, i32
  }
  func.func @transform_2(%arg0: i32) -> (i32, i32) {
    %c0_i32 = arith.constant 0 : i32
    %c0_i32_0 = arith.constant 0 : i32
    %c0_i32_1 = arith.constant 0 : i32
    return %c0_i32, %c0_i32_0 : i32, i32
  }
  func.func @transform_3(%arg0: i32) -> (i32, i32) {
    %c0_i32 = arith.constant 0 : i32
    %c0_i32_0 = arith.constant 0 : i32
    %c0_i32_1 = arith.constant 0 : i32
    return %c0_i32, %c0_i32_0 : i32, i32
  }
  func.func @transform_4(%arg0: i32) -> (i32, i32, i32) {
    %c0_i32 = arith.constant 0 : i32
    %c0_i32_0 = arith.constant 0 : i32
    %c0_i32_1 = arith.constant 0 : i32
    %c0_i32_2 = arith.constant 0 : i32
    return %c0_i32, %c0_i32_0, %c0_i32_1 : i32, i32, i32
  }
  func.func @transform_5(%arg0: i32) -> (i32, i32) {
    %c0_i32 = arith.constant 0 : i32
    %c0_i32_0 = arith.constant 0 : i32
    %c0_i32_1 = arith.constant 0 : i32
    return %c0_i32, %c0_i32_0 : i32, i32
  }
  func.func @transform_6(%arg0: i32) -> (i32, i32) {
    %c0_i32 = arith.constant 0 : i32
    %c0_i32_0 = arith.constant 0 : i32
    %c0_i32_1 = arith.constant 0 : i32
    return %c0_i32, %c0_i32_0 : i32, i32
  }
  func.func @transform_7(%arg0: i32) -> (i32, i32, i32, i32) {
    %c0_i32 = arith.constant 0 : i32
    %c0_i32_0 = arith.constant 0 : i32
    %c0_i32_1 = arith.constant 0 : i32
    %c0_i32_2 = arith.constant 0 : i32
    return %arg0, %c0_i32, %c0_i32_0, %c0_i32_1 : i32, i32, i32, i32
  }
  func.func @transform_8(%arg0: i32) -> (i32, i32, i32, i32) {
    %c0_i32 = arith.constant 0 : i32
    %c0_i32_0 = arith.constant 0 : i32
    %c0_i32_1 = arith.constant 0 : i32
    %c0_i32_2 = arith.constant 0 : i32
    return %arg0, %c0_i32, %c0_i32_0, %c0_i32_1 : i32, i32, i32, i32
  }
}

</mosaic_0001>

<bundles_post_ra>
// kernel: tpu_custom_call.1
= control target key start
LH: loop header
LB: loop body
LE: loop exit
PB: predicated region body
PF: predicated region fallthrough
CT: control target
= control target key end

     0   :  { %s3744_s27 = smov 0   ;;  %s4581_s0 = inlined_call_operand.vmem [shape: bf16[2,18,16,12], index: 0, kind: input, shape index: {}]   ;;  %s4582_s1 = inlined_call_operand.vmem [shape: bf16[3,12,4], index: 1, kind: input, shape index: {}]   ;;  %s4583_s2 = inlined_call_operand.vmem [shape: f32[1,4], index: 2, kind: input, shape index: {}]   ;;  %s4584_s3 = inlined_call_operand.vmem [shape: f32[1,4], index: 3, kind: input, shape index: {}]   ;;  %s4585_s4 = inlined_call_operand.vmem [shape: bf16[3,12,4], index: 4, kind: input, shape index: {}]   ;;  %s4586_s5 = inlined_call_operand.vmem [shape: f32[1,4], index: 5, kind: input, shape index: {}]   ;;  %s4587_s6 = inlined_call_operand.vmem [shape: f32[1,4], index: 6, kind: input, shape index: {}]   ;;  %s4588_s7 = inlined_call_operand.vmem [shape: f32[2,16,16,4], index: 7, kind: input, shape index: {}]   ;;  %s4589_s8 = inlined_call_operand.vmem [shape: f32[2,16,16,4], index: 8, kind: output, shape index: {}]  }
   0x1 LB: > { %s2942_s28 = sadd.s32 4294967295, %s3694_s27   ;;  %p2946_p0 = scmp.ge.s32.totalorder %s3694_s27, 1  ;;  %s3694_s27 = sphi %s3744_s27, %s18_s27  }
   0x2   : > { %p272_p1 = scmp.lt.s32.totalorder %s3694_s27, 3 }
   0x4   : > { %p273_p2 = pnand %p2946_p0, %p272_p1 }
   0x5   : > { %v3634_v0 = vld [vmem:[%s4582_s1 + $0x8] sm:$0x3f] (!%p273_p2)   ;;  %vm531_vm0 = vcmask (!%p273_p2), 1045504   ;;  %p311_p3 = scmp.lt.s32.totalorder (!%p273_p2), %s2942_s28, 1  ;;  %v3636_v2 = vld [vmem:[%s4582_s1] sm:$0x3f] (!%p273_p2)  }
   0x6   : > { %276 = sbr.rel (%p273_p2) target bundleno = 967 (0x3c7), region = 52  ;;  %3616 = vmatprep.subr.msk.bf16.mxu0 (!%p273_p2), %vm531_vm0, %v3634_v0  ;;  %v533_v1 = vsel (!%p273_p2), %vm531_vm0, %v3634_v0, 0  ;;  %vm482_vm1 = vcmask (!%p273_p2), 97280   ;;  %v3653_v3 = vld [vmem:[%s4582_s1 + $0x10] sm:$0x3f] (!%p273_p2)   ;;  %v830_v6 = vsel (!%p273_p2), %vm531_vm0, %v3636_v2, 0 }
   0x7   : > { %3285 = vmatpush3.bf16.msra.mxu0 (!%p273_p2), %v533_v1  ;;  %v1163_v24 = vsel (!%p273_p2), %vm531_vm0, %v3653_v3, 0  ;;  %vm1474_vm2 = vcmask (!%p273_p2), 24576   ;;  %v3696_v54 = vmov (!%p273_p2), 0.0   ;;  %v3914_v55 = vld [vmem:[%s4583_s2] ss:$0 sm:$0xff] (!%p273_p2)  ;;  %vm1491_vm3 = vcmask (!%p273_p2), 31744  }
   0x8   : > { %3617 = vmatprep.subr.msk.bf16.mxu0 (!%p273_p2), %vm531_vm0, %v3636_v2  ;;  %1476 = vst.msk [vmem:[#allocation2 + $0x20] sm:$0x1] (!%p273_p2), %vm1474_vm2, %v3696_v54  ;;  %1475 = vst.msk [vmem:[#allocation2 + $0x10] sm:$0x1] (!%p273_p2), %vm1474_vm2, %v3696_v54  ;;  %v3919_v57 = vld [vmem:[%s4584_s3] ss:$0 sm:$0xff] (!%p273_p2) }
   0x9   : > { %1468 = vst.msk [vmem:[#allocation2] sm:$0xff] (!%p273_p2), %vm482_vm1, %v3696_v54  ;;  %1469 = vst.msk [vmem:[#allocation2 + $0x8] sm:$0xff] (!%p273_p2), %vm482_vm1, %v3696_v54  ;;  %vm1493_vm4 = vcmask (!%p273_p2), 30720   ;;  %s3697_s21 = smov (!%p273_p2), 8   ;;  %s3698_s22 = smov (!%p273_p2), 4   ;;  %vm1653_vm5 = vcmask (!%p273_p2), 64544  }
   0xa   : > { %1471 = vst.msk [vmem:[#allocation2 + $0x110] sm:$0xff] (!%p273_p2), %vm482_vm1, %v3696_v54  ;;  %1472 = vst.msk [vmem:[#allocation2 + $0x118] sm:$0xff] (!%p273_p2), %vm482_vm1, %v3696_v54  ;;  %vm1782_vm6 = vcmask (!%p273_p2), 97345   ;;  %vm1816_vm7 = vcmask (!%p273_p2), 90176   ;;  %vm1784_vm8 = vcmask (!%p273_p2), 97344  }
   0xb   : > { %1477 = vst.msk [vmem:[#allocation2 + $0x30] sm:$0x1] (!%p273_p2), %vm1474_vm2, %v3696_v54  ;;  %1478 = vst.msk [vmem:[#allocation2 + $0x40] sm:$0x1] (!%p273_p2), %vm1474_vm2, %v3696_v54 }
   0xc   : > { %1479 = vst.msk [vmem:[#allocation2 + $0x50] sm:$0x1] (!%p273_p2), %vm1474_vm2, %v3696_v54  ;;  %1480 = vst.msk [vmem:[#allocation2 + $0x60] sm:$0x1] (!%p273_p2), %vm1474_vm2, %v3696_v54 }
   0xd   : > { %s4591_s28 = smov (!%p311_p3, %s2942_s28), 1  ;;  %1481 = vst.msk [vmem:[#allocation2 + $0x70] sm:$0x1] %vm1474_vm2, %v3696_v54  ;;  %1482 = vst.msk [vmem:[#allocation2 + $0x80] sm:$0x1] %vm1474_vm2, %v3696_v54 }
   0xe   : > { %s3622_s11 = smul.u32 144, %s4591_s28  ;;  %1483 = vst.msk [vmem:[#allocation2 + $0x90] sm:$0x1] %vm1474_vm2, %v3696_v54  ;;  %1484 = vst.msk [vmem:[#allocation2 + $0xa0] sm:$0x1] %vm1474_vm2, %v3696_v54  ;;  %s3180_s9 = sshll.u32 %s4591_s28, 8 }
   0xf   : > { %1485 = vst.msk [vmem:[#allocation2 + $0xb0] sm:$0x1] %vm1474_vm2, %v3696_v54  ;;  %1486 = vst.msk [vmem:[#allocation2 + $0xc0] sm:$0x1] %vm1474_vm2, %v3696_v54  ;;  %s4427_s18 = scalar_lea.vmem %s4589_s8, %s3180_s9 }
  0x10   : > { %s3767_s14 = scalar_lea.vmem %s4581_s0, %s3622_s11  ;;  %1487 = vst.msk [vmem:[#allocation2 + $0xd0] sm:$0x1] %vm1474_vm2, %v3696_v54  ;;  %1488 = vst.msk [vmem:[#allocation2 + $0xe0] sm:$0x1] %vm1474_vm2, %v3696_v54 }
  0x11   : > { %v3635_v4 = vld [vmem:[%s3767_s14 + $0x8] sm:$0xff]   ;;  %v3637_v5 = vld [vmem:[%s3767_s14 + $0x10] sm:$0xff]   ;;  %v3638_v7 = vld [vmem:[%s3767_s14 + $0x18] sm:$0xff]   ;;  %1489 = vst.msk [vmem:[#allocation2 + $0xf0] sm:$0x1] %vm1474_vm2, %v3696_v54 }
  0x12   : > { %3286 = vmatprep.mubr.msk.bf16.mxu0 %vm482_vm1, %v3635_v4  ;;  %v3639_v8 = vld [vmem:[%s3767_s14 + $0x20] sm:$0xff]   ;;  %v3640_v9 = vld [vmem:[%s3767_s14 + $0x28] sm:$0xff]   ;;  %v3641_v10 = vld [vmem:[%s3767_s14 + $0x30] sm:$0xff]   ;;  %1490 = vst.msk [vmem:[#allocation2 + $0x100] sm:$0x1] %vm1474_vm2, %v3696_v54 }
  0x13   : > { %3287 = vmatmul.mubr.msk.bf16.vlgmr.msra.gmra.mrb[0].mxu0 %vm482_vm1, %v3637_v5  ;;  %v3642_v11 = vld [vmem:[%s3767_s14 + $0x38] sm:$0xff]   ;;  %v3643_v12 = vld [vmem:[%s3767_s14 + $0x40] sm:$0xff]   ;;  %v3644_v13 = vld [vmem:[%s3767_s14 + $0x48] sm:$0xff]  }
  0x14   : > { %3319 = vmatpush3.bf16.msra.mxu0 %v830_v6  ;;  %3290 = vmatprep.mubr.msk.bf16.mxu0 %vm482_vm1, %v3638_v7  ;;  %v3645_v14 = vld [vmem:[%s3767_s14 + $0x50] sm:$0xff]   ;;  %v3646_v15 = vld [vmem:[%s3767_s14 + $0x58] sm:$0xff]   ;;  %v3647_v16 = vld [vmem:[%s3767_s14 + $0x60] sm:$0xff]  }
  0x15   : > { %3618 = vmatprep.subr.msk.bf16.mxu0 %vm531_vm0, %v3653_v3  ;;  %v3648_v17 = vld [vmem:[%s3767_s14 + $0x68] sm:$0xff]   ;;  %v3649_v18 = vld [vmem:[%s3767_s14 + $0x70] sm:$0xff]   ;;  %v3650_v19 = vld [vmem:[%s3767_s14 + $0x78] sm:$0xff]  }
  0x16   : > { %v3651_v20 = vld [vmem:[%s3767_s14 + $0x80] sm:$0xff]   ;;  %v3654_v22 = vld [vmem:[%s3767_s14 + $0x8] sm:$0xff]   ;;  %v3655_v23 = vld [vmem:[%s3767_s14 + $0x10] sm:$0xff]  }
  0x17   : > { %v3652_v21 = vld [vmem:[%s3767_s14] sm:$0xff]   ;;  %v3656_v25 = vld [vmem:[%s3767_s14 + $0x18] sm:$0xff]   ;;  %v3658_v27 = vld [vmem:[%s3767_s14 + $0x28] sm:$0xff]  }
  0x18   : > { %v3657_v26 = vld [vmem:[%s3767_s14 + $0x20] sm:$0xff]   ;;  %v3659_v28 = vld [vmem:[%s3767_s14 + $0x30] sm:$0xff]   ;;  %v3660_v29 = vld [vmem:[%s3767_s14 + $0x38] sm:$0xff]  }
  0x19   : > { %v3661_v30 = vld [vmem:[%s3767_s14 + $0x40] sm:$0xff]   ;;  %v3662_v31 = vld [vmem:[%s3767_s14 + $0x48] sm:$0xff]   ;;  %v3663_v32 = vld [vmem:[%s3767_s14 + $0x50] sm:$0xff]  }
  0x1a   : > { %v3664_v33 = vld [vmem:[%s3767_s14 + $0x58] sm:$0xff]   ;;  %v3665_v34 = vld [vmem:[%s3767_s14 + $0x60] sm:$0xff]   ;;  %v3666_v35 = vld [vmem:[%s3767_s14 + $0x68] sm:$0xff]  }
  0x1b   : > { %3291 = vmatmul.mubr.msk.bf16.gmra.mrb[4].mxu0 %vm482_vm1, %v3639_v8  ;;  %v3667_v36 = vld [vmem:[%s3767_s14 + $0x70] sm:$0xff]   ;;  %v3668_v37 = vld [vmem:[%s3767_s14 + $0x78] sm:$0xff]   ;;  %v3671_v40 = vld [vmem:[%s3767_s14 + $0x20] sm:$0xff]  }
  0x1c   : > { %3294 = vmatprep.mubr.msk.bf16.mxu0 %vm482_vm1, %v3640_v9  ;;  %v3669_v38 = vld [vmem:[%s3767_s14 + $0x10] sm:$0xff]   ;;  %v3670_v39 = vld [vmem:[%s3767_s14 + $0x18] sm:$0xff]   ;;  %v3672_v41 = vld [vmem:[%s3767_s14 + $0x28] sm:$0xff]  }
  0x1d   : > { %v3673_v42 = vld [vmem:[%s3767_s14 + $0x30] sm:$0xff]   ;;  %v3674_v43 = vld [vmem:[%s3767_s14 + $0x38] sm:$0xff]   ;;  %v3675_v44 = vld [vmem:[%s3767_s14 + $0x40] sm:$0xff]  }
  0x1e   : > { %v3676_v45 = vld [vmem:[%s3767_s14 + $0x48] sm:$0xff]   ;;  %v3677_v46 = vld [vmem:[%s3767_s14 + $0x50] sm:$0xff]   ;;  %v3678_v47 = vld [vmem:[%s3767_s14 + $0x58] sm:$0xff]  }
  0x1f   : > { %v3679_v48 = vld [vmem:[%s3767_s14 + $0x60] sm:$0xff]   ;;  %v3680_v49 = vld [vmem:[%s3767_s14 + $0x68] sm:$0xff]   ;;  %v3681_v50 = vld [vmem:[%s3767_s14 + $0x70] sm:$0xff]  }
  0x20   : > { %v3682_v51 = vld [vmem:[%s3767_s14 + $0x78] sm:$0xff]   ;;  %v3683_v52 = vld [vmem:[%s3767_s14 + $0x80] sm:$0xff]   ;;  %v3684_v53 = vld [vmem:[%s3767_s14 + $0x88] sm:$0xff]   ;;  %s4406_s14 = scalar_lea.vmem %s4588_s7, %s3180_s9 }
  0x23   : > { %3295 = vmatmul.mubr.msk.bf16.gmra.mrb[8].mxu0 %vm482_vm1, %v3641_v10 }
  0x24   : > { %3298 = vmatprep.mubr.msk.bf16.mxu0 %vm482_vm1, %v3642_v11 }
  0x2b   : > { %3299 = vmatmul.mubr.msk.bf16.gmra.mrb[12].mxu0 %vm482_vm1, %v3643_v12 }
  0x2c   : > { %3302 = vmatprep.mubr.msk.bf16.mxu0 %vm482_vm1, %v3644_v13 }
  0x33   : > { %3303 = vmatmul.mubr.msk.bf16.gmra.mrb[16].mxu0 %vm482_vm1, %v3645_v14 }
  0x34   : > { %3306 = vmatprep.mubr.msk.bf16.mxu0 %vm482_vm1, %v3646_v15 }
  0x3b   : > { %3307 = vmatmul.mubr.msk.bf16.gmra.mrb[20].mxu0 %vm482_vm1, %v3647_v16 }
  0x3c   : > { %3310 = vmatprep.mubr.msk.bf16.mxu0 %vm482_vm1, %v3648_v17 }
  0x43   : > { %3311 = vmatmul.mubr.msk.bf16.gmra.mrb[24].mxu0 %vm482_vm1, %v3649_v18 }
  0x44   : > { %3314 = vmatprep.mubr.msk.bf16.mxu0 %vm482_vm1, %v3650_v19  ;;  %v3685_v19 = vld [vmem:[%s4585_s4 + $0x8] sm:$0x3f]  }
  0x45   : > { %3619 = vmatprep.subr.msk.bf16.mxu1 %vm531_vm0, %v3685_v19 }
  0x4b   : > { %3315 = vmatmul.mubr.msk.bf16.gmra.mrb[28].mxu0 %vm482_vm1, %v3651_v20 }
  0x4c   : > { %3320 = vmatprep.mubr.msk.bf16.mxu0 %vm482_vm1, %v3652_v21 }
  0x53   : > { %3321 = vmatmul.mubr.msk.bf16.vlgmr.msra.gmra.mrb[0].mxu0 %vm482_vm1, %v3654_v22 }
  0x54   : > { %3353 = vmatpush3.bf16.msra.mxu0 %v1163_v24  ;;  %3324 = vmatprep.mubr.msk.bf16.mxu0 %vm482_vm1, %v3655_v23  ;;  %v1988_v24 = vsel %vm531_vm0, %v3685_v19, 0 }
  0x55   : > { %3387 = vmatpush3.bf16.msra.mxu1 %v1988_v24 }
  0x5b   : > { %3325 = vmatmul.mubr.msk.bf16.gmra.mrb[4].mxu0 %vm482_vm1, %v3656_v25 }
  0x5c   : > { %3328 = vmatprep.mubr.msk.bf16.mxu0 %vm482_vm1, %v3657_v26 }
  0x63   : > { %3329 = vmatmul.mubr.msk.bf16.gmra.mrb[8].mxu0 %vm482_vm1, %v3658_v27 }
  0x64   : > { %3332 = vmatprep.mubr.msk.bf16.mxu0 %vm482_vm1, %v3659_v28 }
  0x6b   : > { %3333 = vmatmul.mubr.msk.bf16.gmra.mrb[12].mxu0 %vm482_vm1, %v3660_v29 }
  0x6c   : > { %3336 = vmatprep.mubr.msk.bf16.mxu0 %vm482_vm1, %v3661_v30 }
  0x73   : > { %3337 = vmatmul.mubr.msk.bf16.gmra.mrb[16].mxu0 %vm482_vm1, %v3662_v31 }
  0x74   : > { %3340 = vmatprep.mubr.msk.bf16.mxu0 %vm482_vm1, %v3663_v32 }
  0x7b   : > { %3341 = vmatmul.mubr.msk.bf16.gmra.mrb[20].mxu0 %vm482_vm1, %v3664_v33 }
  0x7c   : > { %3344 = vmatprep.mubr.msk.bf16.mxu0 %vm482_vm1, %v3665_v34 }
  0x83   : > { %3345 = vmatmul.mubr.msk.bf16.gmra.mrb[24].mxu0 %vm482_vm1, %v3666_v35 }
  0x84   : > { %3348 = vmatprep.mubr.msk.bf16.mxu0 %vm482_vm1, %v3667_v36 }
  0x8b   : > { %3349 = vmatmul.mubr.msk.bf16.gmra.mrb[28].mxu0 %vm482_vm1, %v3668_v37 }
  0x8c   : > { %3354 = vmatprep.mubr.msk.bf16.mxu0 %vm482_vm1, %v3669_v38 }
  0x93   : > { %3355 = vmatmul.mubr.msk.bf16.vlgmr.msra.gmra.mrb[0].mxu0 %vm482_vm1, %v3670_v39 }
  0x94   : > { %3358 = vmatprep.mubr.msk.bf16.mxu0 %vm482_vm1, %v3671_v40 }
  0x9b   : > { %3359 = vmatmul.mubr.msk.bf16.gmra.mrb[4].mxu0 %vm482_vm1, %v3672_v41 }
  0x9c   : > { %3362 = vmatprep.mubr.msk.bf16.mxu0 %vm482_vm1, %v3673_v42 }
  0xa3   : > { %3363 = vmatmul.mubr.msk.bf16.gmra.mrb[8].mxu0 %vm482_vm1, %v3674_v43 }
  0xa4   : > { %3366 = vmatprep.mubr.msk.bf16.mxu0 %vm482_vm1, %v3675_v44 }
  0xab   : > { %3367 = vmatmul.mubr.msk.bf16.gmra.mrb[12].mxu0 %vm482_vm1, %v3676_v45 }
  0xac   : > { %3370 = vmatprep.mubr.msk.bf16.mxu0 %vm482_vm1, %v3677_v46 }
  0xb3   : > { %3371 = vmatmul.mubr.msk.bf16.gmra.mrb[16].mxu0 %vm482_vm1, %v3678_v47 }
  0xb4   : > { %3374 = vmatprep.mubr.msk.bf16.mxu0 %vm482_vm1, %v3679_v48 }
  0xbb   : > { %3375 = vmatmul.mubr.msk.bf16.gmra.mrb[20].mxu0 %vm482_vm1, %v3680_v49 }
  0xbc   : > { %3378 = vmatprep.mubr.msk.bf16.mxu0 %vm482_vm1, %v3681_v50 }
  0xc3   : > { %3379 = vmatmul.mubr.msk.bf16.gmra.mrb[24].mxu0 %vm482_vm1, %v3682_v51 }
  0xc4   : > { %3382 = vmatprep.mubr.msk.bf16.mxu0 %vm482_vm1, %v3683_v52 }
  0xcb   : > { %3383 = vmatmul.mubr.msk.bf16.gmra.mrb[28].mxu0 %vm482_vm1, %v3684_v53 }
 0x166   : > { %v3356_v56 = vpop.f32.mrb[0].mxu0 }
 0x167   : > { %v1367_v58 = vmul.f32 %v3356_v56, %v3914_v55  ;;  %v1199_v59 = vpop.f32.mrb[1].mxu0 }
 0x168   : > { %v1365_v60 = vmul.f32 %v3914_v55, %v1199_v59  ;;  %v3357_v61 = vpop.f32.mrb[2].mxu0 }
 0x169   : > { %v1406_v62 = vadd.f32 %v3919_v57, %v1367_v58  ;;  %v1368_v63 = vmul.f32 %v3357_v61, %v3914_v55  ;;  %v1202_v0 = vpop.f32.mrb[3].mxu0 }
 0x16a   : > { %v1404_v1 = vadd.f32 %v3919_v57, %v1365_v60  ;;  %v1366_v2 = vmul.f32 %v3914_v55, %v1202_v0 }
 0x16b   : > { %v1438_v3 = vmax.f32 %v1406_v62, 0.0  ;;  %v1407_v4 = vadd.f32 %v3919_v57, %v1368_v63 }
 0x16c   : > { %v1436_v5 = vmax.f32 %v1404_v1, 0.0  ;;  %v1405_v6 = vadd.f32 %v3919_v57, %v1366_v2 }
 0x16d   : > { %v1439_v7 = vmax.f32 %v1407_v4, 0.0  ;;  %1690 = vrot.lane.b32.xlu0 %v1438_v3, %s3697_s21  ;;  %1561 = vrot.lane.b32.xlu1 %v1438_v3, %s3698_s22  ;;  %1495 = vst.msk [vmem:[#allocation2 + $0x21] sm:$0xff] %vm1491_vm3, %v1438_v3 }
 0x16e   : > { %v1437_v8 = vmax.f32 %v1405_v6, 0.0  ;;  %v3360_v9 = vpop.f32.mrb[4].mxu0  ;;  %1492 = vst.msk [vmem:[#allocation2 + $0x11] sm:$0xff] %vm1491_vm3, %v1436_v5 }
 0x16f   : > { %v1371_v10 = vmul.f32 %v3360_v9, %v3914_v55  ;;  %v1215_v11 = vpop.f32.mrb[5].mxu0  ;;  %1496 = vst.msk [vmem:[#allocation2 + $0x29] sm:$0x7f] %vm1493_vm4, %v1439_v7 }
 0x170   : > { %v1369_v12 = vmul.f32 %v3914_v55, %v1215_v11  ;;  %v3361_v13 = vpop.f32.mrb[6].mxu0  ;;  %1494 = vst.msk [vmem:[#allocation2 + $0x19] sm:$0x7f] %vm1493_vm4, %v1437_v8 }
 0x171   : > { %v1410_v14 = vadd.f32 %v3919_v57, %v1371_v10  ;;  %v1372_v15 = vmul.f32 %v3361_v13, %v3914_v55  ;;  %1557 = vrot.lane.b32.xlu0 %v1436_v5, %s3698_s22  ;;  %1563 = vrot.lane.b32.xlu1 %v1439_v7, %s3698_s22  ;;  %v1218_v16 = vpop.f32.mrb[7].mxu0 }
 0x172   : > { %v1408_v17 = vadd.f32 %v3919_v57, %v1369_v12  ;;  %v1370_v18 = vmul.f32 %v3914_v55, %v1218_v16 }
 0x173   : > { %v1442_v20 = vmax.f32 %v1410_v14, 0.0  ;;  %v1411_v21 = vadd.f32 %v3919_v57, %v1372_v15 }
 0x174   : > { %v3947_v22 = vmax.f32 %v1408_v17, 0.0  ;;  %v1409_v23 = vadd.f32 %v3919_v57, %v1370_v18 }
 0x175   : > { %v1443_v25 = vmax.f32 %v1411_v21, 0.0  ;;  %1686 = vrot.lane.b32.xlu0 %v1436_v5, %s3697_s21  ;;  %1692 = vrot.lane.b32.xlu1 %v1439_v7, %s3697_s21  ;;  %1499 = vst.msk [vmem:[#allocation2 + $0x41] sm:$0xff] %vm1491_vm3, %v1442_v20 }
 0x176   : > { %v1441_v26 = vmax.f32 %v1409_v23, 0.0  ;;  %v3364_v27 = vpop.f32.mrb[8].mxu0  ;;  %1497 = vst.msk [vmem:[#allocation2 + $0x31] sm:$0xff] %vm1491_vm3, %v3947_v22 }
 0x177   : > { %v1375_v28 = vmul.f32 %v3364_v27, %v3914_v55  ;;  %v1231_v29 = vpop.f32.mrb[9].mxu0  ;;  %1500 = vst.msk [vmem:[#allocation2 + $0x49] sm:$0x7f] %vm1493_vm4, %v1443_v25 }
 0x178   : > { %v1373_v30 = vmul.f32 %v3914_v55, %v1231_v29  ;;  %v3365_v31 = vpop.f32.mrb[10].mxu0  ;;  %1498 = vst.msk [vmem:[#allocation2 + $0x39] sm:$0x7f] %vm1493_vm4, %v1441_v26 }
 0x179   : > { %v1414_v32 = vadd.f32 %v3919_v57, %v1375_v28  ;;  %v1376_v33 = vmul.f32 %v3365_v31, %v3914_v55  ;;  %1688 = vrot.lane.b32.xlu1 %v1437_v8, %s3697_s21  ;;  %1559 = vrot.lane.b32.xlu0 %v1437_v8, %s3698_s22  ;;  %v1234_v34 = vpop.f32.mrb[11].mxu0 }
 0x17a   : > { %v1412_v35 = vadd.f32 %v3919_v57, %v1373_v30  ;;  %v1374_v36 = vmul.f32 %v3914_v55, %v1234_v34 }
 0x17b   : > { %v3967_v37 = vmax.f32 %v1414_v32, 0.0  ;;  %v1415_v38 = vadd.f32 %v3919_v57, %v1376_v33 }
 0x17c   : > { %v3970_v39 = vmax.f32 %v1412_v35, 0.0  ;;  %v1413_v40 = vadd.f32 %v3919_v57, %v1374_v36 }
 0x17d   : > { %v3973_v41 = vmax.f32 %v1415_v38, 0.0  ;;  %1569 = vrot.lane.b32.xlu0 %v1442_v20, %s3698_s22  ;;  %1571 = vrot.lane.b32.xlu1 %v1443_v25, %s3698_s22  ;;  %1503 = vst.msk [vmem:[#allocation2 + $0x61] sm:$0xff] %vm1491_vm3, %v3967_v37 }
 0x17e   : > { %v3979_v42 = vmax.f32 %v1413_v40, 0.0  ;;  %v3368_v43 = vpop.f32.mrb[12].mxu0  ;;  %1501 = vst.msk [vmem:[#allocation2 + $0x51] sm:$0xff] %vm1491_vm3, %v3970_v39 }
 0x17f   : > { %v1379_v44 = vmul.f32 %v3368_v43, %v3914_v55  ;;  %v1247_v45 = vpop.f32.mrb[13].mxu0  ;;  %1504 = vst.msk [vmem:[#allocation2 + $0x69] sm:$0x7f] %vm1493_vm4, %v3973_v41 }
 0x180   : > { %v1377_v46 = vmul.f32 %v3914_v55, %v1247_v45  ;;  %v3369_v47 = vpop.f32.mrb[14].mxu0  ;;  %1502 = vst.msk [vmem:[#allocation2 + $0x59] sm:$0x7f] %vm1493_vm4, %v3979_v42 }
 0x181   : > { %v1418_v48 = vadd.f32 %v3919_v57, %v1379_v44  ;;  %v1380_v49 = vmul.f32 %v3369_v47, %v3914_v55  ;;  %1698 = vrot.lane.b32.xlu0 %v1442_v20, %s3697_s21  ;;  %1700 = vrot.lane.b32.xlu1 %v1443_v25, %s3697_s21  ;;  %v1250_v50 = vpop.f32.mrb[15].mxu0 }
 0x182   : > { %v1416_v51 = vadd.f32 %v3919_v57, %v1377_v46  ;;  %v1378_v52 = vmul.f32 %v3914_v55, %v1250_v50 }
 0x183   : > { %v3995_v53 = vmax.f32 %v1418_v48, 0.0  ;;  %v1419_v56 = vadd.f32 %v3919_v57, %v1380_v49 }
 0x184   : > { %v3998_v58 = vmax.f32 %v1416_v51, 0.0  ;;  %v1417_v59 = vadd.f32 %v3919_v57, %v1378_v52 }
 0x185   : > { %v4001_v60 = vmax.f32 %v1419_v56, 0.0  ;;  %1565 = vrot.lane.b32.xlu0 %v3947_v22, %s3698_s22  ;;  %1567 = vrot.lane.b32.xlu1 %v1441_v26, %s3698_s22  ;;  %1507 = vst.msk [vmem:[#allocation2 + $0x81] sm:$0xff] %vm1491_vm3, %v3995_v53 }
 0x186   : > { %v4008_v61 = vmax.f32 %v1417_v59, 0.0  ;;  %v3372_v62 = vpop.f32.mrb[16].mxu0  ;;  %1505 = vst.msk [vmem:[#allocation2 + $0x71] sm:$0xff] %vm1491_vm3, %v3998_v58 }
 0x187   : > { %v1383_v63 = vmul.f32 %v3372_v62, %v3914_v55  ;;  %v1263_v0 = vpop.f32.mrb[17].mxu0  ;;  %1508 = vst.msk [vmem:[#allocation2 + $0x89] sm:$0x7f] %vm1493_vm4, %v4001_v60 }
 0x188   : > { %v1381_v1 = vmul.f32 %v3914_v55, %v1263_v0  ;;  %v3373_v2 = vpop.f32.mrb[18].mxu0  ;;  %1506 = vst.msk [vmem:[#allocation2 + $0x79] sm:$0x7f] %vm1493_vm4, %v4008_v61 }
 0x189   : > { %v1422_v3 = vadd.f32 %v3919_v57, %v1383_v63  ;;  %v1384_v4 = vmul.f32 %v3373_v2, %v3914_v55  ;;  %1694 = vrot.lane.b32.xlu0 %v3947_v22, %s3697_s21  ;;  %1696 = vrot.lane.b32.xlu1 %v1441_v26, %s3697_s21  ;;  %v1266_v5 = vpop.f32.mrb[19].mxu0 }
 0x18a   : > { %v1420_v6 = vadd.f32 %v3919_v57, %v1381_v1  ;;  %v1382_v7 = vmul.f32 %v3914_v55, %v1266_v5 }
 0x18b   : > { %v4025_v8 = vmax.f32 %v1422_v3, 0.0  ;;  %v1423_v9 = vadd.f32 %v3919_v57, %v1384_v4 }
 0x18c   : > { %v4028_v10 = vmax.f32 %v1420_v6, 0.0  ;;  %v1421_v11 = vadd.f32 %v3919_v57, %v1382_v7 }
 0x18d   : > { %v4031_v12 = vmax.f32 %v1423_v9, 0.0  ;;  %1577 = vrot.lane.b32.xlu0 %v3967_v37, %s3698_s22  ;;  %1579 = vrot.lane.b32.xlu1 %v3973_v41, %s3698_s22  ;;  %1511 = vst.msk [vmem:[#allocation2 + $0xa1] sm:$0xff] %vm1491_vm3, %v4025_v8 }
 0x18e   : > { %v4039_v13 = vmax.f32 %v1421_v11, 0.0  ;;  %v3376_v14 = vpop.f32.mrb[20].mxu0  ;;  %1509 = vst.msk [vmem:[#allocation2 + $0x91] sm:$0xff] %vm1491_vm3, %v4028_v10 }
 0x18f   : > { %v1387_v15 = vmul.f32 %v3376_v14, %v3914_v55  ;;  %v1279_v16 = vpop.f32.mrb[21].mxu0  ;;  %1512 = vst.msk [vmem:[#allocation2 + $0xa9] sm:$0x7f] %vm1493_vm4, %v4031_v12 }
 0x190   : > { %v1385_v17 = vmul.f32 %v3914_v55, %v1279_v16  ;;  %v3377_v18 = vpop.f32.mrb[22].mxu0  ;;  %1510 = vst.msk [vmem:[#allocation2 + $0x99] sm:$0x7f] %vm1493_vm4, %v4039_v13 }
 0x191   : > { %v1426_v19 = vadd.f32 %v3919_v57, %v1387_v15  ;;  %v1388_v20 = vmul.f32 %v3377_v18, %v3914_v55  ;;  %1706 = vrot.lane.b32.xlu0 %v3967_v37, %s3697_s21  ;;  %1708 = vrot.lane.b32.xlu1 %v3973_v41, %s3697_s21  ;;  %v1282_v21 = vpop.f32.mrb[23].mxu0 }
 0x192   : > { %v1424_v22 = vadd.f32 %v3919_v57, %v1385_v17  ;;  %v1386_v23 = vmul.f32 %v3914_v55, %v1282_v21 }
 0x193   : > { %v4057_v24 = vmax.f32 %v1426_v19, 0.0  ;;  %v1427_v25 = vadd.f32 %v3919_v57, %v1388_v20  ;;  %v4210_v19 = vld [vmem:[%s4585_s4 + $0x10] sm:$0x3f]  }
 0x194   : > { %v4060_v26 = vmax.f32 %v1424_v22, 0.0  ;;  %v1425_v27 = vadd.f32 %v3919_v57, %v1386_v23 }
 0x195   : > { %v4063_v28 = vmax.f32 %v1427_v25, 0.0  ;;  %1573 = vrot.lane.b32.xlu0 %v3970_v39, %s3698_s22  ;;  %1575 = vrot.lane.b32.xlu1 %v3979_v42, %s3698_s22  ;;  %1515 = vst.msk [vmem:[#allocation2 + $0xc1] sm:$0xff] %vm1491_vm3, %v4057_v24 }
 0x196   : > { %v4071_v29 = vmax.f32 %v1425_v27, 0.0  ;;  %v3380_v30 = vpop.f32.mrb[24].mxu0  ;;  %1513 = vst.msk [vmem:[#allocation2 + $0xb1] sm:$0xff] %vm1491_vm3, %v4060_v26 }
 0x197   : > { %v1391_v31 = vmul.f32 %v3380_v30, %v3914_v55  ;;  %v1295_v32 = vpop.f32.mrb[25].mxu0  ;;  %1516 = vst.msk [vmem:[#allocation2 + $0xc9] sm:$0x7f] %vm1493_vm4, %v4063_v28 }
 0x198   : > { %v1389_v33 = vmul.f32 %v3914_v55, %v1295_v32  ;;  %v3381_v34 = vpop.f32.mrb[26].mxu0  ;;  %1514 = vst.msk [vmem:[#allocation2 + $0xb9] sm:$0x7f] %vm1493_vm4, %v4071_v29 }
 0x199   : > { %v1430_v35 = vadd.f32 %v3919_v57, %v1391_v31  ;;  %v1392_v36 = vmul.f32 %v3381_v34, %v3914_v55  ;;  %1702 = vrot.lane.b32.xlu0 %v3970_v39, %s3697_s21  ;;  %1704 = vrot.lane.b32.xlu1 %v3979_v42, %s3697_s21  ;;  %v1298_v37 = vpop.f32.mrb[27].mxu0 }
 0x19a   : > { %v1428_v38 = vadd.f32 %v3919_v57, %v1389_v33  ;;  %v1390_v40 = vmul.f32 %v3914_v55, %v1298_v37 }
 0x19b   : > { %v1462_v41 = vmax.f32 %v1430_v35, 0.0  ;;  %v1431_v43 = vadd.f32 %v3919_v57, %v1392_v36 }
 0x19c   : > { %v1460_v44 = vmax.f32 %v1428_v38, 0.0  ;;  %v1429_v45 = vadd.f32 %v3919_v57, %v1390_v40 }
 0x19d   : > { %v1463_v46 = vmax.f32 %v1431_v43, 0.0  ;;  %1585 = vrot.lane.b32.xlu0 %v3995_v53, %s3698_s22  ;;  %1587 = vrot.lane.b32.xlu1 %v4001_v60, %s3698_s22  ;;  %1519 = vst.msk [vmem:[#allocation2 + $0xe1] sm:$0xff] %vm1491_vm3, %v1462_v41 }
 0x19e   : > { %v1461_v39 = vmax.f32 %v1429_v45, 0.0  ;;  %v3384_v42 = vpop.f32.mrb[28].mxu0  ;;  %1517 = vst.msk [vmem:[#allocation2 + $0xd1] sm:$0xff] %vm1491_vm3, %v1460_v44 }
 0x19f   : > { %v1395_v47 = vmul.f32 %v3384_v42, %v3914_v55  ;;  %v1311_v48 = vpop.f32.mrb[29].mxu0  ;;  %1520 = vst.msk [vmem:[#allocation2 + $0xe9] sm:$0x7f] %vm1493_vm4, %v1463_v46 }
 0x1a0   : > { %v1393_v49 = vmul.f32 %v3914_v55, %v1311_v48  ;;  %v3385_v50 = vpop.f32.mrb[30].mxu0  ;;  %1518 = vst.msk [vmem:[#allocation2 + $0xd9] sm:$0x7f] %vm1493_vm4, %v1461_v39 }
 0x1a1   : > { %v1434_v51 = vadd.f32 %v3919_v57, %v1395_v47  ;;  %v1396_v52 = vmul.f32 %v3385_v50, %v3914_v55  ;;  %1714 = vrot.lane.b32.xlu0 %v3995_v53, %s3697_s21  ;;  %1716 = vrot.lane.b32.xlu1 %v4001_v60, %s3697_s21  ;;  %v1314_v56 = vpop.f32.mrb[31].mxu0 }
 0x1a2   : > { %v1432_v59 = vadd.f32 %v3919_v57, %v1393_v49  ;;  %v1394_v62 = vmul.f32 %v3914_v55, %v1314_v56  ;;  %v4129_v55 = vld [vmem:[%s4585_s4] sm:$0x3f]  }
 0x1a3   : > { %v4109_v63 = vmax.f32 %v1434_v51, 0.0  ;;  %v1435_v0 = vadd.f32 %v3919_v57, %v1396_v52  ;;  %3620 = vmatprep.subr.msk.bf16.mxu1 %vm531_vm0, %v4129_v55  ;;  %v2205_v18 = vsel %vm531_vm0, %v4129_v55, 0 }
 0x1a4   : > { %v1464_v1 = vmax.f32 %v1432_v59, 0.0  ;;  %v1433_v2 = vadd.f32 %v3919_v57, %v1394_v62 }
 0x1a5   : > { %v1467_v3 = vmax.f32 %v1435_v0, 0.0  ;;  %1581 = vrot.lane.b32.xlu0 %v3998_v58, %s3698_s22  ;;  %1583 = vrot.lane.b32.xlu1 %v4008_v61, %s3698_s22  ;;  %1523 = vst.msk [vmem:[#allocation2 + $0x101] sm:$0xff] %vm1491_vm3, %v4109_v63 }
 0x1a6   : > { %v1465_v53 = vmax.f32 %v1433_v2, 0.0  ;;  %1521 = vst.msk [vmem:[#allocation2 + $0xf1] sm:$0xff] %vm1491_vm3, %v1464_v1 }
 0x1a7   : > { %1524 = vst.msk [vmem:[#allocation2 + $0x109] sm:$0x7f] %vm1493_vm4, %v1467_v3 }
 0x1a8   : > { %1522 = vst.msk [vmem:[#allocation2 + $0xf9] sm:$0x7f] %vm1493_vm4, %v1465_v53 }
 0x1a9   : > { %1710 = vrot.lane.b32.xlu0 %v3998_v58, %s3697_s21  ;;  %1712 = vrot.lane.b32.xlu1 %v4008_v61, %s3697_s21 }
 0x1ad   : > { %1593 = vrot.lane.b32.xlu0 %v4025_v8, %s3698_s22  ;;  %1595 = vrot.lane.b32.xlu1 %v4031_v12, %s3698_s22 }
 0x1b1   : > { %1722 = vrot.lane.b32.xlu0 %v4025_v8, %s3697_s21  ;;  %1724 = vrot.lane.b32.xlu1 %v4031_v12, %s3697_s21 }
 0x1b5   : > { %1589 = vrot.lane.b32.xlu0 %v4028_v10, %s3698_s22  ;;  %1591 = vrot.lane.b32.xlu1 %v4039_v13, %s3698_s22 }
 0x1b9   : > { %1718 = vrot.lane.b32.xlu0 %v4028_v10, %s3697_s21  ;;  %1720 = vrot.lane.b32.xlu1 %v4039_v13, %s3697_s21 }
 0x1bd   : > { %1601 = vrot.lane.b32.xlu0 %v4057_v24, %s3698_s22  ;;  %1603 = vrot.lane.b32.xlu1 %v4063_v28, %s3698_s22 }
 0x1c1   : > { %1730 = vrot.lane.b32.xlu0 %v4057_v24, %s3697_s21  ;;  %1732 = vrot.lane.b32.xlu1 %v4063_v28, %s3697_s21 }
 0x1c5   : > { %1597 = vrot.lane.b32.xlu0 %v4060_v26, %s3698_s22  ;;  %1599 = vrot.lane.b32.xlu1 %v4071_v29, %s3698_s22 }
 0x1c9   : > { %1726 = vrot.lane.b32.xlu0 %v4060_v26, %s3697_s21  ;;  %1728 = vrot.lane.b32.xlu1 %v4071_v29, %s3697_s21 }
 0x1cd   : > { %1609 = vrot.lane.b32.xlu0 %v1462_v41, %s3698_s22  ;;  %1611 = vrot.lane.b32.xlu1 %v1463_v46, %s3698_s22 }
 0x1d1   : > { %1738 = vrot.lane.b32.xlu0 %v1462_v41, %s3697_s21  ;;  %1740 = vrot.lane.b32.xlu1 %v1463_v46, %s3697_s21 }
 0x1d5   : > { %1605 = vrot.lane.b32.xlu0 %v1460_v44, %s3698_s22  ;;  %1607 = vrot.lane.b32.xlu1 %v1461_v39, %s3698_s22 }
 0x1d9   : > { %1734 = vrot.lane.b32.xlu0 %v1460_v44, %s3697_s21  ;;  %1736 = vrot.lane.b32.xlu1 %v1461_v39, %s3697_s21 }
 0x1dd   : > { %1617 = vrot.lane.b32.xlu0 %v4109_v63, %s3698_s22  ;;  %1619 = vrot.lane.b32.xlu1 %v1467_v3, %s3698_s22 }
 0x1df   : > { %v1691_v57 = vpop.permute.xlu0 %1690  ;;  %v1562_v58 = vpop.permute.xlu1 %1561 }
 0x1e0   : > { %1656 = vst.msk [vmem:[#allocation2 + $0x20] sm:$0xff] %vm1653_vm5, %v1562_v58 }
 0x1e1   : > { %1786 = vst.msk [vmem:[#allocation2 + $0x1f] sm:$0xfe] %vm1782_vm6, %v1691_v57  ;;  %1613 = vrot.lane.b32.xlu0 %v1464_v1, %s3698_s22  ;;  %1615 = vrot.lane.b32.xlu1 %v1465_v53, %s3698_s22 }
 0x1e3   : > { %v1558_v60 = vpop.permute.xlu0 %1557  ;;  %v1564_v61 = vpop.permute.xlu1 %1563 }
 0x1e4   : > { %1654 = vst.msk [vmem:[#allocation2 + $0x10] sm:$0xff] %vm1653_vm5, %v1558_v60  ;;  %1657 = vst.msk [vmem:[#allocation2 + $0x28] sm:$0xff] %vm1653_vm5, %v1564_v61 }
 0x1e5   : > { %1818 = vst.msk [vmem:[#allocation2 + $0x2f] sm:$0x1] %vm1816_vm7, %v3696_v54  ;;  %1742 = vrot.lane.b32.xlu0 %v1464_v1, %s3697_s21  ;;  %1744 = vrot.lane.b32.xlu1 %v1465_v53, %s3697_s21 }
 0x1e7   : > { %v1687_v4 = vpop.permute.xlu0 %1686  ;;  %v1693_v5 = vpop.permute.xlu1 %1692 }
 0x1e8   : > { %1783 = vst.msk [vmem:[#allocation2 + $0xf] sm:$0xfe] %vm1782_vm6, %v1687_v4 }
 0x1e9   : > { %1787 = vst.msk [vmem:[#allocation2 + $0x27] sm:$0xff] %vm1784_vm8, %v1693_v5  ;;  %1746 = vrot.lane.b32.xlu0 %v4109_v63, %s3697_s21  ;;  %1748 = vrot.lane.b32.xlu1 %v1467_v3, %s3697_s21 }
 0x1eb   : > { %v1689_v6 = vpop.permute.xlu1 %1688  ;;  %v1560_v7 = vpop.permute.xlu0 %1559 }
 0x1ec   : > { %1655 = vst.msk [vmem:[#allocation2 + $0x18] sm:$0xff] %vm1653_vm5, %v1560_v7 }
 0x1ed   : > { %1785 = vst.msk [vmem:[#allocation2 + $0x17] sm:$0xff] %vm1784_vm8, %v1689_v6 }
 0x1ee   : > { %1817 = vst.msk [vmem:[#allocation2 + $0x1f] sm:$0x1] %vm1816_vm7, %v3696_v54 }
 0x1ef   : > { %v1570_v8 = vpop.permute.xlu0 %1569  ;;  %v1572_v9 = vpop.permute.xlu1 %1571 }
 0x1f0   : > { %1660 = vst.msk [vmem:[#allocation2 + $0x40] sm:$0xff] %vm1653_vm5, %v1570_v8  ;;  %1661 = vst.msk [vmem:[#allocation2 + $0x48] sm:$0xff] %vm1653_vm5, %v1572_v9  ;;  %v1885_v12 = vld [vmem:[#allocation2 + $0x20] sm:$0xff]  ;;  %v1886_v13 = vld [vmem:[#allocation2 + $0x28] sm:$0xff] }
 0x1f1   : > { %1820 = vst.msk [vmem:[#allocation2 + $0x4f] sm:$0x1] %vm1816_vm7, %v3696_v54  ;;  %v4203_v17 = vpack.c.bf16 %v1886_v13, %v1885_v12 }
 0x1f3   : > { %v1699_v10 = vpop.permute.xlu0 %1698  ;;  %v1701_v11 = vpop.permute.xlu1 %1700 }
 0x1f4   : > { %1790 = vst.msk [vmem:[#allocation2 + $0x3f] sm:$0xfe] %vm1782_vm6, %v1699_v10  ;;  %v1883_v14 = vld [vmem:[#allocation2 + $0x10] sm:$0xff] }
 0x1f5   : > { %1791 = vst.msk [vmem:[#allocation2 + $0x47] sm:$0xff] %vm1784_vm8, %v1701_v11  ;;  %v1884_v15 = vld [vmem:[#allocation2 + $0x18] sm:$0xff] }
 0x1f6   : > { %v4201_v16 = vpack.c.bf16 %v1884_v15, %v1883_v14 }
 0x1f7   : > { %v1566_v20 = vpop.permute.xlu0 %1565  ;;  %v1568_v21 = vpop.permute.xlu1 %1567 }
 0x1f8   : > { %3388 = vmatprep.mubr.msk.bf16.mxu1 %vm482_vm1, %v4201_v16  ;;  %1658 = vst.msk [vmem:[#allocation2 + $0x30] sm:$0xff] %vm1653_vm5, %v1566_v20  ;;  %1659 = vst.msk [vmem:[#allocation2 + $0x38] sm:$0xff] %vm1653_vm5, %v1568_v21 }
 0x1f9   : > { %3389 = vmatmul.mubr.msk.bf16.vlgmr.msra.gmra.mrb[0].mxu1 %vm482_vm1, %v4203_v17  ;;  %1819 = vst.msk [vmem:[#allocation2 + $0x3f] sm:$0x1] %vm1816_vm7, %v3696_v54 }
 0x1fa   : > { %3421 = vmatpush3.bf16.msra.mxu1 %v2205_v18 }
 0x1fb   : > { %3621 = vmatprep.subr.msk.bf16.mxu1 %vm531_vm0, %v4210_v19  ;;  %v1695_v22 = vpop.permute.xlu0 %1694  ;;  %v1697_v23 = vpop.permute.xlu1 %1696 }
 0x1fc   : > { %1788 = vst.msk [vmem:[#allocation2 + $0x2f] sm:$0xfe] %vm1782_vm6, %v1695_v22  ;;  %v1889_v26 = vld [vmem:[#allocation2 + $0x40] sm:$0xff]  ;;  %v1890_v27 = vld [vmem:[#allocation2 + $0x48] sm:$0xff] }
 0x1fd   : > { %1789 = vst.msk [vmem:[#allocation2 + $0x37] sm:$0xff] %vm1784_vm8, %v1697_v23  ;;  %v4232_v33 = vpack.c.bf16 %v1890_v27, %v1889_v26 }
 0x1ff   : > { %v1578_v24 = vpop.permute.xlu0 %1577  ;;  %v1580_v25 = vpop.permute.xlu1 %1579 }
 0x200   : > { %1664 = vst.msk [vmem:[#allocation2 + $0x60] sm:$0xff] %vm1653_vm5, %v1578_v24  ;;  %1665 = vst.msk [vmem:[#allocation2 + $0x68] sm:$0xff] %vm1653_vm5, %v1580_v25 }
 0x201   : > { %1822 = vst.msk [vmem:[#allocation2 + $0x6f] sm:$0x1] %vm1816_vm7, %v3696_v54 }
 0x203   : > { %v1707_v28 = vpop.permute.xlu0 %1706  ;;  %v1709_v29 = vpop.permute.xlu1 %1708 }
 0x204   : > { %v1887_v30 = vld [vmem:[#allocation2 + $0x30] sm:$0xff]  ;;  %v1888_v31 = vld [vmem:[#allocation2 + $0x38] sm:$0xff]  ;;  %1794 = vst.msk [vmem:[#allocation2 + $0x5f] sm:$0xfe] %vm1782_vm6, %v1707_v28 }
 0x205   : > { %1795 = vst.msk [vmem:[#allocation2 + $0x67] sm:$0xff] %vm1784_vm8, %v1709_v29  ;;  %v4230_v32 = vpack.c.bf16 %v1888_v31, %v1887_v30 }
 0x207   : > { %3392 = vmatprep.mubr.msk.bf16.mxu1 %vm482_vm1, %v4230_v32  ;;  %v1574_v34 = vpop.permute.xlu0 %1573  ;;  %v1576_v35 = vpop.permute.xlu1 %1575 }
 0x208   : > { %3393 = vmatmul.mubr.msk.bf16.gmra.mrb[4].mxu1 %vm482_vm1, %v4232_v33  ;;  %1662 = vst.msk [vmem:[#allocation2 + $0x50] sm:$0xff] %vm1653_vm5, %v1574_v34  ;;  %1663 = vst.msk [vmem:[#allocation2 + $0x58] sm:$0xff] %vm1653_vm5, %v1576_v35 }
 0x209   : > { %1821 = vst.msk [vmem:[#allocation2 + $0x5f] sm:$0x1] %vm1816_vm7, %v3696_v54 }
 0x20b   : > { %v1703_v36 = vpop.permute.xlu0 %1702  ;;  %v1705_v37 = vpop.permute.xlu1 %1704 }
 0x20c   : > { %1792 = vst.msk [vmem:[#allocation2 + $0x4f] sm:$0xfe] %vm1782_vm6, %v1703_v36  ;;  %v1893_v41 = vld [vmem:[#allocation2 + $0x60] sm:$0xff]  ;;  %v1894_v43 = vld [vmem:[#allocation2 + $0x68] sm:$0xff] }
 0x20d   : > { %1793 = vst.msk [vmem:[#allocation2 + $0x57] sm:$0xff] %vm1784_vm8, %v1705_v37  ;;  %v4252_v47 = vpack.c.bf16 %v1894_v43, %v1893_v41 }
 0x20f   : > { %v1586_v38 = vpop.permute.xlu0 %1585  ;;  %v1588_v40 = vpop.permute.xlu1 %1587 }
 0x210   : > { %1668 = vst.msk [vmem:[#allocation2 + $0x80] sm:$0xff] %vm1653_vm5, %v1586_v38  ;;  %1669 = vst.msk [vmem:[#allocation2 + $0x88] sm:$0xff] %vm1653_vm5, %v1588_v40 }
 0x211   : > { %1824 = vst.msk [vmem:[#allocation2 + $0x8f] sm:$0x1] %vm1816_vm7, %v3696_v54 }
 0x213   : > { %v1715_v44 = vpop.permute.xlu0 %1714  ;;  %v1717_v45 = vpop.permute.xlu1 %1716 }
 0x214   : > { %v1891_v46 = vld [vmem:[#allocation2 + $0x50] sm:$0xff]  ;;  %v1892_v39 = vld [vmem:[#allocation2 + $0x58] sm:$0xff]  ;;  %1798 = vst.msk [vmem:[#allocation2 + $0x7f] sm:$0xfe] %vm1782_vm6, %v1715_v44 }
 0x215   : > { %1799 = vst.msk [vmem:[#allocation2 + $0x87] sm:$0xff] %vm1784_vm8, %v1717_v45  ;;  %v4250_v42 = vpack.c.bf16 %v1892_v39, %v1891_v46 }
 0x217   : > { %3396 = vmatprep.mubr.msk.bf16.mxu1 %vm482_vm1, %v4250_v42  ;;  %v1582_v48 = vpop.permute.xlu0 %1581  ;;  %v1584_v49 = vpop.permute.xlu1 %1583 }
 0x218   : > { %3397 = vmatmul.mubr.msk.bf16.gmra.mrb[8].mxu1 %vm482_vm1, %v4252_v47  ;;  %1666 = vst.msk [vmem:[#allocation2 + $0x70] sm:$0xff] %vm1653_vm5, %v1582_v48  ;;  %1667 = vst.msk [vmem:[#allocation2 + $0x78] sm:$0xff] %vm1653_vm5, %v1584_v49 }
 0x219   : > { %1823 = vst.msk [vmem:[#allocation2 + $0x7f] sm:$0x1] %vm1816_vm7, %v3696_v54 }
 0x21b   : > { %v1711_v50 = vpop.permute.xlu0 %1710  ;;  %v1713_v51 = vpop.permute.xlu1 %1712 }
 0x21c   : > { %1796 = vst.msk [vmem:[#allocation2 + $0x6f] sm:$0xfe] %vm1782_vm6, %v1711_v50  ;;  %v1897_v59 = vld [vmem:[#allocation2 + $0x80] sm:$0xff]  ;;  %v1898_v62 = vld [vmem:[#allocation2 + $0x88] sm:$0xff] }
 0x21d   : > { %1797 = vst.msk [vmem:[#allocation2 + $0x77] sm:$0xff] %vm1784_vm8, %v1713_v51  ;;  %v4272_v53 = vpack.c.bf16 %v1898_v62, %v1897_v59  ;;  %v1833_v59 = vld [vmem:[#allocation2] sm:$0xff]  ;;  %v1834_v62 = vld [vmem:[#allocation2 + $0x8] sm:$0xff] }
 0x21f   : > { %v1594_v52 = vpop.permute.xlu0 %1593  ;;  %v1596_v56 = vpop.permute.xlu1 %1595 }
 0x220   : > { %1672 = vst.msk [vmem:[#allocation2 + $0xa0] sm:$0xff] %vm1653_vm5, %v1594_v52  ;;  %1673 = vst.msk [vmem:[#allocation2 + $0xa8] sm:$0xff] %vm1653_vm5, %v1596_v56 }
 0x221   : > { %1826 = vst.msk [vmem:[#allocation2 + $0xaf] sm:$0x1] %vm1816_vm7, %v3696_v54 }
 0x223   : > { %v1723_v63 = vpop.permute.xlu0 %1722  ;;  %v1725_v0 = vpop.permute.xlu1 %1724 }
 0x224   : > { %v1895_v1 = vld [vmem:[#allocation2 + $0x70] sm:$0xff]  ;;  %v1896_v2 = vld [vmem:[#allocation2 + $0x78] sm:$0xff]  ;;  %1802 = vst.msk [vmem:[#allocation2 + $0x9f] sm:$0xfe] %vm1782_vm6, %v1723_v63 }
 0x225   : > { %1803 = vst.msk [vmem:[#allocation2 + $0xa7] sm:$0xff] %vm1784_vm8, %v1725_v0  ;;  %v4270_v3 = vpack.c.bf16 %v1896_v2, %v1895_v1  ;;  %v1865_v1 = vpack.c.bf16 %v1834_v62, %v1833_v59 }
 0x227   : > { %3400 = vmatprep.mubr.msk.bf16.mxu1 %vm482_vm1, %v4270_v3  ;;  %v1590_v55 = vpop.permute.xlu0 %1589  ;;  %v1592_v57 = vpop.permute.xlu1 %1591 }
 0x228   : > { %3401 = vmatmul.mubr.msk.bf16.gmra.mrb[12].mxu1 %vm482_vm1, %v4272_v53  ;;  %1670 = vst.msk [vmem:[#allocation2 + $0x90] sm:$0xff] %vm1653_vm5, %v1590_v55  ;;  %1671 = vst.msk [vmem:[#allocation2 + $0x98] sm:$0xff] %vm1653_vm5, %v1592_v57  ;;  %v2474_v55 = vsel %vm531_vm0, %v4210_v19, 0 }
 0x229   : > { %1825 = vst.msk [vmem:[#allocation2 + $0x9f] sm:$0x1] %vm1816_vm7, %v3696_v54 }
 0x22b   : > { %v1719_v58 = vpop.permute.xlu0 %1718  ;;  %v1721_v60 = vpop.permute.xlu1 %1720 }
 0x22c   : > { %1800 = vst.msk [vmem:[#allocation2 + $0x8f] sm:$0xfe] %vm1782_vm6, %v1719_v58  ;;  %v1901_v5 = vld [vmem:[#allocation2 + $0xa0] sm:$0xff]  ;;  %v1902_v6 = vld [vmem:[#allocation2 + $0xa8] sm:$0xff] }
 0x22d   : > { %1801 = vst.msk [vmem:[#allocation2 + $0x97] sm:$0xff] %vm1784_vm8, %v1721_v60  ;;  %v4292_v12 = vpack.c.bf16 %v1902_v6, %v1901_v5 }
 0x22f   : > { %v1602_v61 = vpop.permute.xlu0 %1601  ;;  %v1604_v4 = vpop.permute.xlu1 %1603 }
 0x230   : > { %1676 = vst.msk [vmem:[#allocation2 + $0xc0] sm:$0xff] %vm1653_vm5, %v1602_v61  ;;  %1677 = vst.msk [vmem:[#allocation2 + $0xc8] sm:$0xff] %vm1653_vm5, %v1604_v4  ;;  %v2747_v61 = vld [vmem:[%s4406_s14] sm:$0xff] }
 0x231   : > { %1828 = vst.msk [vmem:[#allocation2 + $0xcf] sm:$0x1] %vm1816_vm7, %v3696_v54 }
 0x233   : > { %v1731_v7 = vpop.permute.xlu0 %1730  ;;  %v1733_v8 = vpop.permute.xlu1 %1732 }
 0x234   : > { %v1899_v9 = vld [vmem:[#allocation2 + $0x90] sm:$0xff]  ;;  %v1900_v10 = vld [vmem:[#allocation2 + $0x98] sm:$0xff]  ;;  %1806 = vst.msk [vmem:[#allocation2 + $0xbf] sm:$0xfe] %vm1782_vm6, %v1731_v7 }
 0x235   : > { %1807 = vst.msk [vmem:[#allocation2 + $0xc7] sm:$0xff] %vm1784_vm8, %v1733_v8  ;;  %v4290_v11 = vpack.c.bf16 %v1900_v10, %v1899_v9  ;;  %v2750_v7 = vld [vmem:[%s4406_s14 + $0x18] sm:$0xff] }
 0x237   : > { %3404 = vmatprep.mubr.msk.bf16.mxu1 %vm482_vm1, %v4290_v11  ;;  %v1598_v13 = vpop.permute.xlu0 %1597  ;;  %v1600_v14 = vpop.permute.xlu1 %1599 }
 0x238   : > { %3405 = vmatmul.mubr.msk.bf16.gmra.mrb[16].mxu1 %vm482_vm1, %v4292_v12  ;;  %1674 = vst.msk [vmem:[#allocation2 + $0xb0] sm:$0xff] %vm1653_vm5, %v1598_v13  ;;  %1675 = vst.msk [vmem:[#allocation2 + $0xb8] sm:$0xff] %vm1653_vm5, %v1600_v14 }
 0x239   : > { %1827 = vst.msk [vmem:[#allocation2 + $0xbf] sm:$0x1] %vm1816_vm7, %v3696_v54 }
 0x23b   : > { %v1727_v15 = vpop.permute.xlu0 %1726  ;;  %v1729_v18 = vpop.permute.xlu1 %1728 }
 0x23c   : > { %1804 = vst.msk [vmem:[#allocation2 + $0xaf] sm:$0xfe] %vm1782_vm6, %v1727_v15  ;;  %v1905_v22 = vld [vmem:[#allocation2 + $0xc0] sm:$0xff]  ;;  %v1906_v23 = vld [vmem:[#allocation2 + $0xc8] sm:$0xff] }
 0x23d   : > { %1805 = vst.msk [vmem:[#allocation2 + $0xb7] sm:$0xff] %vm1784_vm8, %v1729_v18  ;;  %v4312_v29 = vpack.c.bf16 %v1906_v23, %v1905_v22 }
 0x23f   : > { %v1610_v20 = vpop.permute.xlu0 %1609  ;;  %v1612_v21 = vpop.permute.xlu1 %1611 }
 0x240   : > { %1680 = vst.msk [vmem:[#allocation2 + $0xe0] sm:$0xff] %vm1653_vm5, %v1610_v20  ;;  %1681 = vst.msk [vmem:[#allocation2 + $0xe8] sm:$0xff] %vm1653_vm5, %v1612_v21 }
 0x241   : > { %1830 = vst.msk [vmem:[#allocation2 + $0xef] sm:$0x1] %vm1816_vm7, %v3696_v54 }
 0x243   : > { %v1739_v24 = vpop.permute.xlu0 %1738  ;;  %v1741_v25 = vpop.permute.xlu1 %1740 }
 0x244   : > { %v1903_v26 = vld [vmem:[#allocation2 + $0xb0] sm:$0xff]  ;;  %v1904_v27 = vld [vmem:[#allocation2 + $0xb8] sm:$0xff]  ;;  %1810 = vst.msk [vmem:[#allocation2 + $0xdf] sm:$0xfe] %vm1782_vm6, %v1739_v24 }
 0x245   : > { %1811 = vst.msk [vmem:[#allocation2 + $0xe7] sm:$0xff] %vm1784_vm8, %v1741_v25  ;;  %v4310_v28 = vpack.c.bf16 %v1904_v27, %v1903_v26  ;;  %v2753_v26 = vld [vmem:[%s4406_s14 + $0x30] sm:$0xff] }
 0x247   : > { %3408 = vmatprep.mubr.msk.bf16.mxu1 %vm482_vm1, %v4310_v28  ;;  %v1606_v30 = vpop.permute.xlu0 %1605  ;;  %v1608_v31 = vpop.permute.xlu1 %1607 }
 0x248   : > { %3409 = vmatmul.mubr.msk.bf16.gmra.mrb[20].mxu1 %vm482_vm1, %v4312_v29  ;;  %1678 = vst.msk [vmem:[#allocation2 + $0xd0] sm:$0xff] %vm1653_vm5, %v1606_v30  ;;  %1679 = vst.msk [vmem:[#allocation2 + $0xd8] sm:$0xff] %vm1653_vm5, %v1608_v31  ;;  %v2751_v30 = vld [vmem:[%s4406_s14 + $0x20] sm:$0xff] }
 0x249   : > { %1829 = vst.msk [vmem:[#allocation2 + $0xdf] sm:$0x1] %vm1816_vm7, %v3696_v54 }
 0x24b   : > { %v1735_v34 = vpop.permute.xlu0 %1734  ;;  %v1737_v35 = vpop.permute.xlu1 %1736 }
 0x24c   : > { %1808 = vst.msk [vmem:[#allocation2 + $0xcf] sm:$0xfe] %vm1782_vm6, %v1735_v34  ;;  %v1909_v38 = vld [vmem:[#allocation2 + $0xe0] sm:$0xff]  ;;  %v1910_v40 = vld [vmem:[#allocation2 + $0xe8] sm:$0xff] }
 0x24d   : > { %1809 = vst.msk [vmem:[#allocation2 + $0xd7] sm:$0xff] %vm1784_vm8, %v1737_v35  ;;  %v1928_v39 = vpack.c.bf16 %v1910_v40, %v1909_v38 }
 0x24f   : > { %v1618_v36 = vpop.permute.xlu0 %1617  ;;  %v1620_v37 = vpop.permute.xlu1 %1619 }
 0x250   : > { %1684 = vst.msk [vmem:[#allocation2 + $0x100] sm:$0xff] %vm1653_vm5, %v1618_v36  ;;  %1685 = vst.msk [vmem:[#allocation2 + $0x108] sm:$0xff] %vm1653_vm5, %v1620_v37  ;;  %v2754_v36 = vld [vmem:[%s4406_s14 + $0x38] sm:$0xff] }
 0x251   : > { %1832 = vst.msk [vmem:[#allocation2 + $0x10f] sm:$0x1] %vm1816_vm7, %v3696_v54 }
 0x253   : > { %v1614_v41 = vpop.permute.xlu0 %1613  ;;  %v1616_v43 = vpop.permute.xlu1 %1615 }
 0x254   : > { %v1907_v44 = vld [vmem:[#allocation2 + $0xd0] sm:$0xff]  ;;  %v1908_v45 = vld [vmem:[#allocation2 + $0xd8] sm:$0xff]  ;;  %1682 = vst.msk [vmem:[#allocation2 + $0xf0] sm:$0xff] %vm1653_vm5, %v1614_v41  ;;  %1683 = vst.msk [vmem:[#allocation2 + $0xf8] sm:$0xff] %vm1653_vm5, %v1616_v43 }
 0x255   : > { %v1927_v46 = vpack.c.bf16 %v1908_v45, %v1907_v44  ;;  %1831 = vst.msk [vmem:[#allocation2 + $0xff] sm:$0x1] %vm1816_vm7, %v3696_v54  ;;  %v2752_v41 = vld [vmem:[%s4406_s14 + $0x28] sm:$0xff] }
 0x257   : > { %3412 = vmatprep.mubr.msk.bf16.mxu1 %vm482_vm1, %v1927_v46  ;;  %v1743_v48 = vpop.permute.xlu0 %1742  ;;  %v1745_v49 = vpop.permute.xlu1 %1744 }
 0x258   : > { %3413 = vmatmul.mubr.msk.bf16.gmra.mrb[24].mxu1 %vm482_vm1, %v1928_v39  ;;  %1812 = vst.msk [vmem:[#allocation2 + $0xef] sm:$0xfe] %vm1782_vm6, %v1743_v48 }
 0x259   : > { %1813 = vst.msk [vmem:[#allocation2 + $0xf7] sm:$0xff] %vm1784_vm8, %v1745_v49 }
 0x25b   : > { %v1747_v50 = vpop.permute.xlu0 %1746  ;;  %v1749_v51 = vpop.permute.xlu1 %1748 }
 0x25c   : > { %1814 = vst.msk [vmem:[#allocation2 + $0xff] sm:$0xfe] %vm1782_vm6, %v1747_v50 }
 0x25d   : > { %1815 = vst.msk [vmem:[#allocation2 + $0x107] sm:$0xff] %vm1784_vm8, %v1749_v51 }
 0x260   : > { %v1911_v52 = vld [vmem:[#allocation2 + $0xf0] sm:$0xff]  ;;  %v1912_v56 = vld [vmem:[#allocation2 + $0xf8] sm:$0xff] }
 0x261   : > { %v1929_v54 = vpack.c.bf16 %v1912_v56, %v1911_v52 }
 0x263   : > { %3416 = vmatprep.mubr.msk.bf16.mxu1 %vm482_vm1, %v1929_v54 }
 0x264   : > { %v1913_v63 = vld [vmem:[#allocation2 + $0x100] sm:$0xff]  ;;  %v1914_v0 = vld [vmem:[#allocation2 + $0x108] sm:$0xff] }
 0x265   : > { %v1930_v2 = vpack.c.bf16 %v1914_v0, %v1913_v63  ;;  %v2755_v0 = vld [vmem:[%s4406_s14 + $0x40] sm:$0xff] }
 0x267   : > { %3417 = vmatmul.mubr.msk.bf16.gmra.mrb[28].mxu1 %vm482_vm1, %v1930_v2 }
 0x268   : > { %3422 = vmatprep.mubr.msk.bf16.mxu1 %vm482_vm1, %v1865_v1 }
 0x26f   : > { %3423 = vmatmul.mubr.msk.bf16.vlgmr.msra.gmra.mrb[0].mxu1 %vm482_vm1, %v4201_v16  ;;  %v2399_v16 = vld [vmem:[#allocation2 + $0x110] sm:$0xff] }
 0x270   : > { %3455 = vmatpush3.bf16.msra.mxu1 %v2474_v55  ;;  %3426 = vmatprep.mubr.msk.bf16.mxu1 %vm482_vm1, %v4203_v17 }
 0x277   : > { %3427 = vmatmul.mubr.msk.bf16.gmra.mrb[4].mxu1 %vm482_vm1, %v4230_v32 }
 0x278   : > { %3430 = vmatprep.mubr.msk.bf16.mxu1 %vm482_vm1, %v4232_v33 }
 0x27f   : > { %3431 = vmatmul.mubr.msk.bf16.gmra.mrb[8].mxu1 %vm482_vm1, %v4250_v42 }
 0x280   : > { %3434 = vmatprep.mubr.msk.bf16.mxu1 %vm482_vm1, %v4252_v47 }
 0x287   : > { %3435 = vmatmul.mubr.msk.bf16.gmra.mrb[12].mxu1 %vm482_vm1, %v4270_v3 }
 0x288   : > { %3438 = vmatprep.mubr.msk.bf16.mxu1 %vm482_vm1, %v4272_v53 }
 0x28f   : > { %3439 = vmatmul.mubr.msk.bf16.gmra.mrb[16].mxu1 %vm482_vm1, %v4290_v11 }
 0x290   : > { %3442 = vmatprep.mubr.msk.bf16.mxu1 %vm482_vm1, %v4292_v12 }
 0x297   : > { %3443 = vmatmul.mubr.msk.bf16.gmra.mrb[20].mxu1 %vm482_vm1, %v4310_v28 }
 0x298   : > { %3446 = vmatprep.mubr.msk.bf16.mxu1 %vm482_vm1, %v4312_v29 }
 0x29f   : > { %3447 = vmatmul.mubr.msk.bf16.gmra.mrb[24].mxu1 %vm482_vm1, %v1927_v46 }
 0x2a0   : > { %3450 = vmatprep.mubr.msk.bf16.mxu1 %vm482_vm1, %v1928_v39 }
 0x2a7   : > { %3451 = vmatmul.mubr.msk.bf16.gmra.mrb[28].mxu1 %vm482_vm1, %v1929_v54 }
 0x2a8   : > { %3456 = vmatprep.mubr.msk.bf16.mxu1 %vm482_vm1, %v4203_v17  ;;  %v2400_v17 = vld [vmem:[#allocation2 + $0x118] sm:$0xff] }
 0x2a9   : > { %v2416_v19 = vpack.c.bf16 %v2400_v17, %v2399_v16  ;;  %v2758_v16 = vld [vmem:[%s4406_s14 + $0x58] sm:$0xff] }
 0x2af   : > { %3457 = vmatmul.mubr.msk.bf16.vlgmr.msra.gmra.mrb[0].mxu1 %vm482_vm1, %v4230_v32  ;;  %v4401_v32 = vld [vmem:[%s4586_s5] ss:$0 sm:$0xff] }
 0x2b0   : > { %3460 = vmatprep.mubr.msk.bf16.mxu1 %vm482_vm1, %v4232_v33 }
 0x2b7   : > { %3461 = vmatmul.mubr.msk.bf16.gmra.mrb[4].mxu1 %vm482_vm1, %v4250_v42  ;;  %v4411_v42 = vld [vmem:[%s4587_s6] ss:$0 sm:$0xff] }
 0x2b8   : > { %3464 = vmatprep.mubr.msk.bf16.mxu1 %vm482_vm1, %v4252_v47 }
 0x2bf   : > { %3465 = vmatmul.mubr.msk.bf16.gmra.mrb[8].mxu1 %vm482_vm1, %v4270_v3 }
 0x2c0   : > { %3468 = vmatprep.mubr.msk.bf16.mxu1 %vm482_vm1, %v4272_v53  ;;  %v2749_v53 = vld [vmem:[%s4406_s14 + $0x10] sm:$0xff] }
 0x2c7   : > { %3469 = vmatmul.mubr.msk.bf16.gmra.mrb[12].mxu1 %vm482_vm1, %v4290_v11  ;;  %v2748_v11 = vld [vmem:[%s4406_s14 + $0x8] sm:$0xff] }
 0x2c8   : > { %3472 = vmatprep.mubr.msk.bf16.mxu1 %vm482_vm1, %v4292_v12 }
 0x2cf   : > { %3473 = vmatmul.mubr.msk.bf16.gmra.mrb[16].mxu1 %vm482_vm1, %v4310_v28 }
 0x2d0   : > { %3476 = vmatprep.mubr.msk.bf16.mxu1 %vm482_vm1, %v4312_v29 }
 0x2d7   : > { %3477 = vmatmul.mubr.msk.bf16.gmra.mrb[20].mxu1 %vm482_vm1, %v1927_v46 }
 0x2d8   : > { %3480 = vmatprep.mubr.msk.bf16.mxu1 %vm482_vm1, %v1928_v39 }
 0x2df   : > { %3481 = vmatmul.mubr.msk.bf16.gmra.mrb[24].mxu1 %vm482_vm1, %v1929_v54  ;;  %v2757_v54 = vld [vmem:[%s4406_s14 + $0x50] sm:$0xff] }
 0x2e0   : > { %3484 = vmatprep.mubr.msk.bf16.mxu1 %vm482_vm1, %v1930_v2 }
 0x2e7   : > { %3485 = vmatmul.mubr.msk.bf16.gmra.mrb[28].mxu1 %vm482_vm1, %v2416_v19 }
 0x382   : > { %v3458_v33 = vpop.f32.mrb[0].mxu1 }
 0x383   : > { %v2678_v47 = vmul.f32 %v3458_v33, %v4401_v32  ;;  %v2510_v3 = vpop.f32.mrb[1].mxu1 }
 0x384   : > { %v2676_v57 = vmul.f32 %v4401_v32, %v2510_v3  ;;  %v3459_v58 = vpop.f32.mrb[2].mxu1 }
 0x385   : > { %v2717_v60 = vadd.f32 %v4411_v42, %v2678_v47  ;;  %v2679_v4 = vmul.f32 %v3459_v58, %v4401_v32  ;;  %v2513_v5 = vpop.f32.mrb[3].mxu1  ;;  %v2756_v47 = vld [vmem:[%s4406_s14 + $0x48] sm:$0xff] }
 0x386   : > { %v2715_v6 = vadd.f32 %v4411_v42, %v2676_v57  ;;  %v2677_v8 = vmul.f32 %v4401_v32, %v2513_v5 }
 0x387   : > { %v2781_v9 = vadd.f32 %v2749_v53, %v2717_v60  ;;  %v2718_v10 = vadd.f32 %v4411_v42, %v2679_v4 }
 0x388   : > { %v2779_v12 = vadd.f32 %v2747_v61, %v2715_v6  ;;  %v2716_v13 = vadd.f32 %v4411_v42, %v2677_v8 }
 0x389   : > { %v2813_v14 = vmax.f32 %v2781_v9, 0.0  ;;  %v2782_v15 = vadd.f32 %v2750_v7, %v2718_v10  ;;  %v2761_v9 = vld [vmem:[%s4406_s14 + $0x70] sm:$0xff] }
 0x38a   : > { %v2811_v18 = vmax.f32 %v2779_v12, 0.0  ;;  %v2780_v20 = vadd.f32 %v2748_v11, %v2716_v13  ;;  %v3462_v21 = vpop.f32.mrb[4].mxu1  ;;  %v2759_v13 = vld [vmem:[%s4406_s14 + $0x60] sm:$0xff] }
 0x38b   : > { %2845 = vst.msk [vmem:[%s4427_s18 + $0x10] sm:$0xff] %vm1491_vm3, %v2813_v14  ;;  %v2814_v22 = vmax.f32 %v2782_v15, 0.0  ;;  %v2682_v23 = vmul.f32 %v3462_v21, %v4401_v32  ;;  %v2526_v24 = vpop.f32.mrb[5].mxu1 }
 0x38c   : > { %2843 = vst.msk [vmem:[%s4427_s18] sm:$0xff] %vm1491_vm3, %v2811_v18  ;;  %v2812_v25 = vmax.f32 %v2780_v20, 0.0  ;;  %v2680_v27 = vmul.f32 %v4401_v32, %v2526_v24  ;;  %v3463_v28 = vpop.f32.mrb[6].mxu1  ;;  %v2762_v20 = vld [vmem:[%s4406_s14 + $0x78] sm:$0xff]  ;;  %v2760_v24 = vld [vmem:[%s4406_s14 + $0x68] sm:$0xff] }
 0x38d   : > { %2846 = vst.msk [vmem:[%s4427_s18 + $0x18] sm:$0xff] %vm1491_vm3, %v2814_v22  ;;  %v2721_v29 = vadd.f32 %v4411_v42, %v2682_v23  ;;  %v2683_v31 = vmul.f32 %v3463_v28, %v4401_v32  ;;  %v2529_v34 = vpop.f32.mrb[7].mxu1 }
 0x38e   : > { %2844 = vst.msk [vmem:[%s4427_s18 + $0x8] sm:$0xff] %vm1491_vm3, %v2812_v25  ;;  %v2719_v35 = vadd.f32 %v4411_v42, %v2680_v27  ;;  %v2681_v37 = vmul.f32 %v4401_v32, %v2529_v34 }
 0x38f   : > { %v2785_v38 = vadd.f32 %v2753_v26, %v2721_v29  ;;  %v2722_v40 = vadd.f32 %v4411_v42, %v2683_v31 }
 0x390   : > { %v2783_v43 = vadd.f32 %v2751_v30, %v2719_v35  ;;  %v2720_v44 = vadd.f32 %v4411_v42, %v2681_v37 }
 0x391   : > { %v2817_v45 = vmax.f32 %v2785_v38, 0.0  ;;  %v2786_v46 = vadd.f32 %v2754_v36, %v2722_v40  ;;  %v2765_v38 = vld [vmem:[%s4406_s14 + $0x90] sm:$0xff] }
 0x392   : > { %v2815_v39 = vmax.f32 %v2783_v43, 0.0  ;;  %v2784_v48 = vadd.f32 %v2752_v41, %v2720_v44  ;;  %v3466_v49 = vpop.f32.mrb[8].mxu1  ;;  %v2763_v44 = vld [vmem:[%s4406_s14 + $0x80] sm:$0xff] }
 0x393   : > { %2849 = vst.msk [vmem:[%s4427_s18 + $0x30] sm:$0xff] %vm1491_vm3, %v2817_v45  ;;  %v2818_v50 = vmax.f32 %v2786_v46, 0.0  ;;  %v2686_v51 = vmul.f32 %v3466_v49, %v4401_v32  ;;  %v2542_v52 = vpop.f32.mrb[9].mxu1 }
 0x394   : > { %2847 = vst.msk [vmem:[%s4427_s18 + $0x20] sm:$0xff] %vm1491_vm3, %v2815_v39  ;;  %v2816_v56 = vmax.f32 %v2784_v48, 0.0  ;;  %v2684_v59 = vmul.f32 %v4401_v32, %v2542_v52  ;;  %v3467_v62 = vpop.f32.mrb[10].mxu1  ;;  %v2766_v48 = vld [vmem:[%s4406_s14 + $0x98] sm:$0xff]  ;;  %v2764_v52 = vld [vmem:[%s4406_s14 + $0x88] sm:$0xff] }
 0x395   : > { %2850 = vst.msk [vmem:[%s4427_s18 + $0x38] sm:$0xff] %vm1491_vm3, %v2818_v50  ;;  %v2725_v63 = vadd.f32 %v4411_v42, %v2686_v51  ;;  %v2687_v1 = vmul.f32 %v3467_v62, %v4401_v32  ;;  %v2545_v2 = vpop.f32.mrb[11].mxu1 }
 0x396   : > { %2848 = vst.msk [vmem:[%s4427_s18 + $0x28] sm:$0xff] %vm1491_vm3, %v2816_v56  ;;  %v2723_v55 = vadd.f32 %v4411_v42, %v2684_v59  ;;  %v2685_v17 = vmul.f32 %v4401_v32, %v2545_v2 }
 0x397   : > { %v2789_v19 = vadd.f32 %v2757_v54, %v2725_v63  ;;  %v2726_v33 = vadd.f32 %v4411_v42, %v2687_v1 }
 0x398   : > { %v2787_v3 = vadd.f32 %v2755_v0, %v2723_v55  ;;  %v2724_v53 = vadd.f32 %v4411_v42, %v2685_v17 }
 0x399   : > { %v2821_v57 = vmax.f32 %v2789_v19, 0.0  ;;  %v2790_v58 = vadd.f32 %v2758_v16, %v2726_v33  ;;  %v2769_v19 = vld [vmem:[%s4406_s14 + $0xb0] sm:$0xff] }
 0x39a   : > { %v2819_v60 = vmax.f32 %v2787_v3, 0.0  ;;  %v2788_v61 = vadd.f32 %v2756_v47, %v2724_v53  ;;  %v3470_v4 = vpop.f32.mrb[12].mxu1  ;;  %v2767_v53 = vld [vmem:[%s4406_s14 + $0xa0] sm:$0xff] }
 0x39b   : > { %2853 = vst.msk [vmem:[%s4427_s18 + $0x50] sm:$0xff] %vm1491_vm3, %v2821_v57  ;;  %v2822_v5 = vmax.f32 %v2790_v58, 0.0  ;;  %v2690_v6 = vmul.f32 %v3470_v4, %v4401_v32  ;;  %v2558_v7 = vpop.f32.mrb[13].mxu1 }
 0x39c   : > { %2851 = vst.msk [vmem:[%s4427_s18 + $0x40] sm:$0xff] %vm1491_vm3, %v2819_v60  ;;  %v2820_v8 = vmax.f32 %v2788_v61, 0.0  ;;  %v2688_v10 = vmul.f32 %v4401_v32, %v2558_v7  ;;  %v3471_v11 = vpop.f32.mrb[14].mxu1  ;;  %v2770_v61 = vld [vmem:[%s4406_s14 + $0xb8] sm:$0xff]  ;;  %v2768_v7 = vld [vmem:[%s4406_s14 + $0xa8] sm:$0xff] }
 0x39d   : > { %2854 = vst.msk [vmem:[%s4427_s18 + $0x58] sm:$0xff] %vm1491_vm3, %v2822_v5  ;;  %v2729_v12 = vadd.f32 %v4411_v42, %v2690_v6  ;;  %v2691_v14 = vmul.f32 %v3471_v11, %v4401_v32  ;;  %v2561_v15 = vpop.f32.mrb[15].mxu1 }
 0x39e   : > { %2852 = vst.msk [vmem:[%s4427_s18 + $0x48] sm:$0xff] %vm1491_vm3, %v2820_v8  ;;  %v2727_v18 = vadd.f32 %v4411_v42, %v2688_v10  ;;  %v2689_v21 = vmul.f32 %v4401_v32, %v2561_v15 }
 0x39f   : > { %v2793_v22 = vadd.f32 %v2761_v9, %v2729_v12  ;;  %v2730_v23 = vadd.f32 %v4411_v42, %v2691_v14 }
 0x3a0   : > { %v2791_v25 = vadd.f32 %v2759_v13, %v2727_v18  ;;  %v2728_v26 = vadd.f32 %v4411_v42, %v2689_v21 }
 0x3a1   : > { %v2825_v27 = vmax.f32 %v2793_v22, 0.0  ;;  %v2794_v28 = vadd.f32 %v2762_v20, %v2730_v23  ;;  %v2773_v22 = vld [vmem:[%s4406_s14 + $0xd0] sm:$0xff] }
 0x3a2   : > { %v2823_v29 = vmax.f32 %v2791_v25, 0.0  ;;  %v2792_v30 = vadd.f32 %v2760_v24, %v2728_v26  ;;  %v3474_v31 = vpop.f32.mrb[16].mxu1  ;;  %v2771_v26 = vld [vmem:[%s4406_s14 + $0xc0] sm:$0xff] }
 0x3a3   : > { %2857 = vst.msk [vmem:[%s4427_s18 + $0x70] sm:$0xff] %vm1491_vm3, %v2825_v27  ;;  %v2826_v34 = vmax.f32 %v2794_v28, 0.0  ;;  %v2694_v35 = vmul.f32 %v3474_v31, %v4401_v32  ;;  %v2574_v36 = vpop.f32.mrb[17].mxu1 }
 0x3a4   : > { %2855 = vst.msk [vmem:[%s4427_s18 + $0x60] sm:$0xff] %vm1491_vm3, %v2823_v29  ;;  %v2824_v37 = vmax.f32 %v2792_v30, 0.0  ;;  %v2692_v40 = vmul.f32 %v4401_v32, %v2574_v36  ;;  %v3475_v41 = vpop.f32.mrb[18].mxu1  ;;  %v2774_v30 = vld [vmem:[%s4406_s14 + $0xd8] sm:$0xff]  ;;  %v2772_v36 = vld [vmem:[%s4406_s14 + $0xc8] sm:$0xff] }
 0x3a5   : > { %2858 = vst.msk [vmem:[%s4427_s18 + $0x78] sm:$0xff] %vm1491_vm3, %v2826_v34  ;;  %v2733_v43 = vadd.f32 %v4411_v42, %v2694_v35  ;;  %v2695_v45 = vmul.f32 %v3475_v41, %v4401_v32  ;;  %v2577_v46 = vpop.f32.mrb[19].mxu1 }
 0x3a6   : > { %2856 = vst.msk [vmem:[%s4427_s18 + $0x68] sm:$0xff] %vm1491_vm3, %v2824_v37  ;;  %v2731_v39 = vadd.f32 %v4411_v42, %v2692_v40  ;;  %v2693_v49 = vmul.f32 %v4401_v32, %v2577_v46 }
 0x3a7   : > { %v2797_v50 = vadd.f32 %v2765_v38, %v2733_v43  ;;  %v2734_v51 = vadd.f32 %v4411_v42, %v2695_v45 }
 0x3a8   : > { %v2795_v56 = vadd.f32 %v2763_v44, %v2731_v39  ;;  %v2732_v54 = vadd.f32 %v4411_v42, %v2693_v49 }
 0x3a9   : > { %v2829_v59 = vmax.f32 %v2797_v50, 0.0  ;;  %v2798_v62 = vadd.f32 %v2766_v48, %v2734_v51  ;;  %v2777_v50 = vld [vmem:[%s4406_s14 + $0xf0] sm:$0xff] }
 0x3aa   : > { %v2827_v63 = vmax.f32 %v2795_v56, 0.0  ;;  %v2796_v0 = vadd.f32 %v2764_v52, %v2732_v54  ;;  %v3478_v1 = vpop.f32.mrb[20].mxu1  ;;  %v2775_v54 = vld [vmem:[%s4406_s14 + $0xe0] sm:$0xff] }
 0x3ab   : > { %2861 = vst.msk [vmem:[%s4427_s18 + $0x90] sm:$0xff] %vm1491_vm3, %v2829_v59  ;;  %v2830_v2 = vmax.f32 %v2798_v62, 0.0  ;;  %v2698_v55 = vmul.f32 %v3478_v1, %v4401_v32  ;;  %v2590_v16 = vpop.f32.mrb[21].mxu1 }
 0x3ac   : > { %2859 = vst.msk [vmem:[%s4427_s18 + $0x80] sm:$0xff] %vm1491_vm3, %v2827_v63  ;;  %v2828_v17 = vmax.f32 %v2796_v0, 0.0  ;;  %v2696_v33 = vmul.f32 %v4401_v32, %v2590_v16  ;;  %v3479_v47 = vpop.f32.mrb[22].mxu1  ;;  %v2778_v0 = vld [vmem:[%s4406_s14 + $0xf8] sm:$0xff]  ;;  %v2776_v16 = vld [vmem:[%s4406_s14 + $0xe8] sm:$0xff] }
 0x3ad   : > { %2862 = vst.msk [vmem:[%s4427_s18 + $0x98] sm:$0xff] %vm1491_vm3, %v2830_v2  ;;  %v2737_v3 = vadd.f32 %v4411_v42, %v2698_v55  ;;  %v2699_v57 = vmul.f32 %v3479_v47, %v4401_v32  ;;  %v2593_v58 = vpop.f32.mrb[23].mxu1 }
 0x3ae   : > { %2860 = vst.msk [vmem:[%s4427_s18 + $0x88] sm:$0xff] %vm1491_vm3, %v2828_v17  ;;  %v2735_v60 = vadd.f32 %v4411_v42, %v2696_v33  ;;  %v2697_v4 = vmul.f32 %v4401_v32, %v2593_v58 }
 0x3af   : > { %v2801_v5 = vadd.f32 %v2769_v19, %v2737_v3  ;;  %v2738_v6 = vadd.f32 %v4411_v42, %v2699_v57 }
 0x3b0   : > { %v2799_v8 = vadd.f32 %v2767_v53, %v2735_v60  ;;  %v2736_v9 = vadd.f32 %v4411_v42, %v2697_v4 }
 0x3b1   : > { %v2833_v10 = vmax.f32 %v2801_v5, 0.0  ;;  %v2802_v11 = vadd.f32 %v2770_v61, %v2738_v6 }
 0x3b2   : > { %v2831_v12 = vmax.f32 %v2799_v8, 0.0  ;;  %v2800_v13 = vadd.f32 %v2768_v7, %v2736_v9  ;;  %v3482_v14 = vpop.f32.mrb[24].mxu1 }
 0x3b3   : > { %2865 = vst.msk [vmem:[%s4427_s18 + $0xb0] sm:$0xff] %vm1491_vm3, %v2833_v10  ;;  %v2834_v15 = vmax.f32 %v2802_v11, 0.0  ;;  %v2702_v18 = vmul.f32 %v3482_v14, %v4401_v32  ;;  %v2606_v20 = vpop.f32.mrb[25].mxu1 }
 0x3b4   : > { %2863 = vst.msk [vmem:[%s4427_s18 + $0xa0] sm:$0xff] %vm1491_vm3, %v2831_v12  ;;  %v2832_v21 = vmax.f32 %v2800_v13, 0.0  ;;  %v2700_v23 = vmul.f32 %v4401_v32, %v2606_v20  ;;  %v3483_v24 = vpop.f32.mrb[26].mxu1 }
 0x3b5   : > { %2866 = vst.msk [vmem:[%s4427_s18 + $0xb8] sm:$0xff] %vm1491_vm3, %v2834_v15  ;;  %v2741_v25 = vadd.f32 %v4411_v42, %v2702_v18  ;;  %v2703_v27 = vmul.f32 %v3483_v24, %v4401_v32  ;;  %v2609_v28 = vpop.f32.mrb[27].mxu1 }
 0x3b6   : > { %2864 = vst.msk [vmem:[%s4427_s18 + $0xa8] sm:$0xff] %vm1491_vm3, %v2832_v21  ;;  %v2739_v29 = vadd.f32 %v4411_v42, %v2700_v23  ;;  %v2701_v31 = vmul.f32 %v4401_v32, %v2609_v28 }
 0x3b7   : > { %v2805_v34 = vadd.f32 %v2773_v22, %v2741_v25  ;;  %v2742_v35 = vadd.f32 %v4411_v42, %v2703_v27 }
 0x3b8   : > { %v2803_v37 = vadd.f32 %v2771_v26, %v2739_v29  ;;  %v2740_v38 = vadd.f32 %v4411_v42, %v2701_v31 }
 0x3b9   : > { %v2837_v40 = vmax.f32 %v2805_v34, 0.0  ;;  %v2806_v41 = vadd.f32 %v2774_v30, %v2742_v35 }
 0x3ba   : > { %v2835_v43 = vmax.f32 %v2803_v37, 0.0  ;;  %v2804_v44 = vadd.f32 %v2772_v36, %v2740_v38  ;;  %v3486_v45 = vpop.f32.mrb[28].mxu1 }
 0x3bb   : > { %2869 = vst.msk [vmem:[%s4427_s18 + $0xd0] sm:$0xff] %vm1491_vm3, %v2837_v40  ;;  %v2838_v46 = vmax.f32 %v2806_v41, 0.0  ;;  %v2706_v39 = vmul.f32 %v3486_v45, %v4401_v32  ;;  %v2622_v48 = vpop.f32.mrb[29].mxu1 }
 0x3bc   : > { %2867 = vst.msk [vmem:[%s4427_s18 + $0xc0] sm:$0xff] %vm1491_vm3, %v2835_v43  ;;  %v2836_v49 = vmax.f32 %v2804_v44, 0.0  ;;  %v2704_v51 = vmul.f32 %v4401_v32, %v2622_v48  ;;  %v3487_v52 = vpop.f32.mrb[30].mxu1 }
 0x3bd   : > { %2870 = vst.msk [vmem:[%s4427_s18 + $0xd8] sm:$0xff] %vm1491_vm3, %v2838_v46  ;;  %v2745_v56 = vadd.f32 %v4411_v42, %v2706_v39  ;;  %v2707_v59 = vmul.f32 %v3487_v52, %v4401_v32  ;;  %v2625_v62 = vpop.f32.mrb[31].mxu1 }
 0x3be   : > { %2868 = vst.msk [vmem:[%s4427_s18 + $0xc8] sm:$0xff] %vm1491_vm3, %v2836_v49  ;;  %v2743_v63 = vadd.f32 %v4411_v42, %v2704_v51  ;;  %v2705_v1 = vmul.f32 %v4401_v32, %v2625_v62 }
 0x3bf   : > { %v2809_v2 = vadd.f32 %v2777_v50, %v2745_v56  ;;  %v2746_v55 = vadd.f32 %v4411_v42, %v2707_v59 }
 0x3c0   : > { %v2807_v17 = vadd.f32 %v2775_v54, %v2743_v63  ;;  %v2744_v19 = vadd.f32 %v4411_v42, %v2705_v1 }
 0x3c1   : > { %v2841_v33 = vmax.f32 %v2809_v2, 0.0  ;;  %v2810_v47 = vadd.f32 %v2778_v0, %v2746_v55 }
 0x3c2   : > { %v2839_v3 = vmax.f32 %v2807_v17, 0.0  ;;  %v2808_v53 = vadd.f32 %v2776_v16, %v2744_v19 }
 0x3c3   : > { %2873 = vst.msk [vmem:[%s4427_s18 + $0xf0] sm:$0xff] %vm1491_vm3, %v2841_v33  ;;  %v2842_v57 = vmax.f32 %v2810_v47, 0.0 }
 0x3c4   : > { %2871 = vst.msk [vmem:[%s4427_s18 + $0xe0] sm:$0xff] %vm1491_vm3, %v2839_v3  ;;  %v2840_v58 = vmax.f32 %v2808_v53, 0.0 }
 0x3c5   : > { %2874 = vst.msk [vmem:[%s4427_s18 + $0xf8] sm:$0xff] %vm1491_vm3, %v2842_v57 }
 0x3c6   : > { %2872 = vst.msk [vmem:[%s4427_s18 + $0xe8] sm:$0xff] %vm1491_vm3, %v2840_v58 }
 0x3c7 PF: > { %s18_s27 = sadd.s32 1, %s3694_s27  }
 0x3c8   : > { %p15_p4 = scmp.ge.s32.totalorder %s18_s27, 4  }
 0x3ca   :  { %17 = sbr.rel (!%p15_p4) target bundleno = 1 (0x1), region = 94 }

</bundles_post_ra>
